<compile_context>
chip_gen: v5e
topology: v5e:2x2
jax: 0.10.0
libtpu: 0.0.40
codegen_flags: <defaults>
</compile_context>

<pallas_src>
import functools
import math

import jax
import jax.numpy as jnp
from jax.experimental import pallas as pl
from jax.experimental.pallas import tpu as pltpu

# Annotated-transformer style LayerNorm epsilon.
EPS = 1e-6


def _layernorm(x, g, b):
    """Single-pass LayerNorm: mean and E[x^2] in one sweep, gamma folded in."""
    mean = jnp.mean(x, axis=-1, keepdims=True)
    msq = jnp.mean(x * x, axis=-1, keepdims=True)
    var = msq - mean * mean
    return (x - mean) * (jax.lax.rsqrt(var + EPS) * g) + b


# --------------------------------------------------------------------------
# Pallas kernel: one full encoder layer for a tile of Bb batch elements
# --------------------------------------------------------------------------
def encoder_layer_kernel(num_head,
                         x_ref, mbias_ref,
                         ln1g_ref, ln1b_ref,
                         wq_ref, bq_ref, wk_ref, bk_ref, wv_ref, bv_ref,
                         wo_ref, bo_ref,
                         ln2g_ref, ln2b_ref,
                         w1_ref, b1_ref, w2_ref, b2_ref,
                         o_ref, ctx_ref):
    Bb, S, H = x_ref.shape
    R = Bb * S
    dh = H // num_head
    scale = 1.0 / math.sqrt(dh)

    # Residual stream in f32, rows folded for the MXU.
    x = x_ref[...].astype(jnp.float32).reshape(R, H)            # (R, H)
    mbias = mbias_ref[...]                                       # (Bb, 1, S) additive

    # ---- sublayer 1: pre-LN multi-head self-attention + residual ----------
    y = _layernorm(x, ln1g_ref[...], ln1b_ref[...])
    y16 = y.astype(jnp.bfloat16)                                 # bf16 -> MXU native
    q = jnp.dot(y16, wq_ref[...], preferred_element_type=jnp.float32) + bq_ref[...]
    k = jnp.dot(y16, wk_ref[...], preferred_element_type=jnp.float32) + bk_ref[...]
    v = jnp.dot(y16, wv_ref[...], preferred_element_type=jnp.float32) + bv_ref[...]

    # Cast once, fold the softmax scale into q, restore the per-batch view so
    # attention never crosses batch boundaries within the folded block.
    q16 = (q * scale).astype(jnp.bfloat16).reshape(Bb, S, H)
    k16 = k.astype(jnp.bfloat16).reshape(Bb, S, H)
    v16 = v.astype(jnp.bfloat16).reshape(Bb, S, H)

    # Per-head attention; contexts are written into their H-slice of a VMEM
    # scratch so the output projection can be one full-H contraction.
    # TODO(synk): for non-toy S this loop should become a flash-style online
    # softmax over a KV-tile grid axis; at demo shapes everything fits VMEM.
    for h in range(num_head):                                    # static head loop
        lo = h * dh
        qh = q16[:, :, lo:lo + dh]                               # (Bb, S, dh) bf16
        kh = k16[:, :, lo:lo + dh]
        vh = v16[:, :, lo:lo + dh]
        s = jnp.einsum('bqd,bkd->bqk', qh, kh,
                       preferred_element_type=jnp.float32)       # (Bb, S, S)
        s = s + mbias                                            # additive key mask
        s = s - jnp.max(s, axis=-1, keepdims=True)
        p = jnp.exp(s)
        p = p * pl.reciprocal(jnp.sum(p, axis=-1, keepdims=True), approx=True)
        ctx_h = jnp.einsum('bqk,bkd->bqd', p.astype(jnp.bfloat16), vh,
                           preferred_element_type=jnp.float32)   # (Bb, S, dh)
        ctx_ref[:, :, lo:lo + dh] = ctx_h

    # Single full-H (K=H) output projection over all folded rows.
    ctx = ctx_ref[...].reshape(R, H).astype(jnp.bfloat16)
    attn = jnp.dot(ctx, wo_ref[...], preferred_element_type=jnp.float32) + bo_ref[...]
    # nn.Dropout(p) is identity in eval mode.
    x1 = x + attn

    # ---- sublayer 2: pre-LN position-wise feed-forward + residual ---------
    y2 = _layernorm(x1, ln2g_ref[...], ln2b_ref[...]).astype(jnp.bfloat16)
    h1 = jnp.dot(y2, w1_ref[...], preferred_element_type=jnp.float32) + b1_ref[...]
    h1 = jnp.maximum(h1, 0.0).astype(jnp.bfloat16)
    ff = jnp.dot(h1, w2_ref[...], preferred_element_type=jnp.float32) + b2_ref[...]
    o_ref[...] = (x1 + ff).reshape(Bb, S, H).astype(o_ref.dtype)


# --------------------------------------------------------------------------
# Wrapper (pallas_call plumbing)
# --------------------------------------------------------------------------
def _const_spec(shape):
    # Weights / biases / LN params: same block for every grid step.
    # (On v7x at large H/M, add pipeline_mode=pl.Buffered(1) here to
    #  single-buffer these grid-invariant blocks inside the 64 MiB VMEM.)
    return pl.BlockSpec(shape, lambda b: tuple(0 for _ in shape))


def encoder_layer(x, mask, p, num_head, *, rows_target=256):
    """x: (B, S, H) f32.  mask: (B, 1, S), nonzero = attend, 0 = masked key."""
    B, S, H = x.shape
    M = p["w1"].shape[1]

    # Fold enough batch elements into one block that the MXU sees ~rows_target
    # rows per dot (256-aligned targets feed the v6e/v7x 256-wide MXU).
    Bb = max(1, min(B, rows_target // max(S, 1)))
    while B % Bb:
        Bb -= 1

    # Precompute the key mask as an additive bias once (0 keep / -1e9 masked);
    # it stays per-batch-row (Bb, 1, S) inside each folded block.
    mask_bias = jnp.where(mask > 0, 0.0, -1e9).astype(jnp.float32)   # (B, 1, S)

    kernel = functools.partial(encoder_layer_kernel, num_head)
    in_specs = [
        pl.BlockSpec((Bb, S, H), lambda b: (b, 0, 0)),   # x
        pl.BlockSpec((Bb, 1, S), lambda b: (b, 0, 0)),   # additive key-mask bias
        _const_spec((1, H)), _const_spec((1, H)),        # ln1 gamma / beta
        _const_spec((H, H)), _const_spec((1, H)),        # wq, bq
        _const_spec((H, H)), _const_spec((1, H)),        # wk, bk
        _const_spec((H, H)), _const_spec((1, H)),        # wv, bv
        _const_spec((H, H)), _const_spec((1, H)),        # wo, bo
        _const_spec((1, H)), _const_spec((1, H)),        # ln2 gamma / beta
        _const_spec((H, M)), _const_spec((1, M)),        # w1, b1
        _const_spec((M, H)), _const_spec((1, H)),        # w2, b2
    ]
    return pl.pallas_call(
        kernel,
        out_shape=jax.ShapeDtypeStruct((B, S, H), x.dtype),
        grid=(B // Bb,),
        in_specs=in_specs,
        out_specs=pl.BlockSpec((Bb, S, H), lambda b: (b, 0, 0)),
        scratch_shapes=[pltpu.VMEM((Bb, S, H), jnp.float32)],   # per-head context slab
        compiler_params=pltpu.CompilerParams(
            dimension_semantics=("parallel",),
            vmem_limit_bytes=48 * 1024 * 1024),
    )(x, mask_bias,
      p["ln1_g"], p["ln1_b"],
      p["wq"], p["bq"], p["wk"], p["bk"], p["wv"], p["bv"], p["wo"], p["bo"],
      p["ln2_g"], p["ln2_b"],
      p["w1"], p["b1"], p["w2"], p["b2"])


# --------------------------------------------------------------------------
# Pure-JAX reference (same math as the PyTorch module, f32 activations)
# --------------------------------------------------------------------------
def encoder_layer_ref(x, mask, p, num_head):
    f32 = lambda a: a.astype(jnp.float32)

    def ln(t, g, b):
        mean = t.mean(-1, keepdims=True)
        var = ((t - mean) ** 2).mean(-1, keepdims=True)
        return (t - mean) / jnp.sqrt(var + EPS) * g + b

    B, S, H = x.shape
    dh = H // num_head

    y = ln(x, f32(p["ln1_g"]), f32(p["ln1_b"]))
    q = y @ f32(p["wq"]) + p["bq"]
    k = y @ f32(p["wk"]) + p["bk"]
    v = y @ f32(p["wv"]) + p["bv"]

    split = lambda t: t.reshape(B, S, num_head, dh).transpose(0, 2, 1, 3)
    qh, kh, vh = split(q), split(k), split(v)
    s = jnp.einsum('bhqd,bhkd->bhqk', qh, kh) / math.sqrt(dh)
    keep = mask.reshape(B, 1, 1, S) > 0
    s = jnp.where(keep, s, -1e9)
    a = jax.nn.softmax(s, axis=-1)
    ctx = jnp.einsum('bhqk,bhkd->bhqd', a, vh).transpose(0, 2, 1, 3).reshape(B, S, H)
    x1 = x + (ctx @ f32(p["wo"]) + p["bo"])

    y2 = ln(x1, f32(p["ln2_g"]), f32(p["ln2_b"]))
    h1 = jnp.maximum(y2 @ f32(p["w1"]) + p["b1"], 0.0)
    return x1 + (h1 @ f32(p["w2"]) + p["b2"])


# --------------------------------------------------------------------------
# Parameter init
# --------------------------------------------------------------------------
def init_params(key, hidden, mid_dim):
    keys = jax.random.split(key, 6)
    # Weights stored in bf16 (MXU-native operands, half the DMA bytes);
    # biases / LN params kept in f32 since they are added to f32 accumulators.
    w = lambda k, shp: (0.02 * jax.random.normal(k, shp, jnp.float32)).astype(jnp.bfloat16)
    zeros = lambda n: jnp.zeros((1, n), jnp.float32)
    ones = lambda n: jnp.ones((1, n), jnp.float32)
    return {
        "ln1_g": ones(hidden), "ln1_b": zeros(hidden),
        "wq": w(keys[0], (hidden, hidden)), "bq": zeros(hidden),
        "wk": w(keys[1], (hidden, hidden)), "bk": zeros(hidden),
        "wv": w(keys[2], (hidden, hidden)), "bv": zeros(hidden),
        "wo": w(keys[3], (hidden, hidden)), "bo": zeros(hidden),
        "ln2_g": ones(hidden), "ln2_b": zeros(hidden),
        "w1": w(keys[4], (hidden, mid_dim)), "b1": zeros(mid_dim),
        "w2": w(keys[5], (mid_dim, hidden)), "b2": zeros(hidden),
    }


if __name__ == "__main__":
    # Small but lane-dense demo shapes: H = 128 keeps every last dim a full
    # lane width, dh = 32 per head, M = 2*H.  Both batch elements fold into a
    # single (B*S, H) row block inside the kernel.
    B, S, H = 2, 8, 128
    NUM_HEAD, MID_DIM = 4, 256

    key = jax.random.PRNGKey(0)
    kx, kp = jax.random.split(key)

    x = jax.random.normal(kx, (B, S, H), jnp.float32)
    mask = jnp.ones((B, S), jnp.int32).at[1, 6:].set(0)   # pad last 2 keys of batch 1
    mask3 = mask.reshape(B, 1, S).astype(jnp.float32)     # key-only mask (B, 1, S)

    params = init_params(kp, H, MID_DIM)

    out = encoder_layer(x, mask3, params, NUM_HEAD)
    out = jax.block_until_ready(out)
    assert out.shape == (B, S, H)
    assert bool(jnp.all(jnp.isfinite(out)))

    # Tolerance check vs. the exact-math reference (bf16 activations + approx
    # softmax reciprocal are the only deviations).
    ref = encoder_layer_ref(x, mask3, params, NUM_HEAD)
    max_err = float(jnp.max(jnp.abs(out - ref)))
    assert max_err < 3e-2, f"max abs error vs reference: {max_err}"

    print("KERNEL_OK")
</pallas_src>

<mosaic_0001>
module attributes {stable_mosaic.version = 11 : i64} {
  func.func @encoder_layer_kernel(%arg0: i32, %arg1: memref<2x8x128xf32, #tpu.memory_space<vmem>>, %arg2: memref<2x1x8xf32, #tpu.memory_space<vmem>>, %arg3: memref<1x128xf32, #tpu.memory_space<vmem>>, %arg4: memref<1x128xf32, #tpu.memory_space<vmem>>, %arg5: memref<128x128xbf16, #tpu.memory_space<vmem>>, %arg6: memref<1x128xf32, #tpu.memory_space<vmem>>, %arg7: memref<128x128xbf16, #tpu.memory_space<vmem>>, %arg8: memref<1x128xf32, #tpu.memory_space<vmem>>, %arg9: memref<128x128xbf16, #tpu.memory_space<vmem>>, %arg10: memref<1x128xf32, #tpu.memory_space<vmem>>, %arg11: memref<128x128xbf16, #tpu.memory_space<vmem>>, %arg12: memref<1x128xf32, #tpu.memory_space<vmem>>, %arg13: memref<1x128xf32, #tpu.memory_space<vmem>>, %arg14: memref<1x128xf32, #tpu.memory_space<vmem>>, %arg15: memref<128x256xbf16, #tpu.memory_space<vmem>>, %arg16: memref<1x256xf32, #tpu.memory_space<vmem>>, %arg17: memref<256x128xbf16, #tpu.memory_space<vmem>>, %arg18: memref<1x128xf32, #tpu.memory_space<vmem>>, %arg19: memref<2x8x128xf32, #tpu.memory_space<vmem>>, %arg20: memref<2x8x128xf32, #tpu.memory_space<vmem>>) attributes {dimension_semantics = [#tpu.dimension_semantics<parallel>], iteration_bounds = array<i64: 1>, scalar_prefetch = 0 : i64, scratch_operands = 1 : i64, tpu.core_type = #tpu.core_type<tc>, window_params = [{transform_indices = @transform_0, window_bounds = array<i64: 2, 8, 128>}, {transform_indices = @transform_1, window_bounds = array<i64: 2, 1, 8>}, {pipeline_mode = #tpu.pipeline_mode<synchronous>, transform_indices = @transform_2, window_bounds = array<i64: 1, 128>}, {pipeline_mode = #tpu.pipeline_mode<synchronous>, transform_indices = @transform_3, window_bounds = array<i64: 1, 128>}, {pipeline_mode = #tpu.pipeline_mode<synchronous>, transform_indices = @transform_4, window_bounds = array<i64: 128, 128>}, {pipeline_mode = #tpu.pipeline_mode<synchronous>, transform_indices = @transform_5, window_bounds = array<i64: 1, 128>}, {pipeline_mode = #tpu.pipeline_mode<synchronous>, transform_indices = @transform_6, window_bounds = array<i64: 128, 128>}, {pipeline_mode = #tpu.pipeline_mode<synchronous>, transform_indices = @transform_7, window_bounds = array<i64: 1, 128>}, {pipeline_mode = #tpu.pipeline_mode<synchronous>, transform_indices = @transform_8, window_bounds = array<i64: 128, 128>}, {pipeline_mode = #tpu.pipeline_mode<synchronous>, transform_indices = @transform_9, window_bounds = array<i64: 1, 128>}, {pipeline_mode = #tpu.pipeline_mode<synchronous>, transform_indices = @transform_10, window_bounds = array<i64: 128, 128>}, {pipeline_mode = #tpu.pipeline_mode<synchronous>, transform_indices = @transform_11, window_bounds = array<i64: 1, 128>}, {pipeline_mode = #tpu.pipeline_mode<synchronous>, transform_indices = @transform_12, window_bounds = array<i64: 1, 128>}, {pipeline_mode = #tpu.pipeline_mode<synchronous>, transform_indices = @transform_13, window_bounds = array<i64: 1, 128>}, {pipeline_mode = #tpu.pipeline_mode<synchronous>, transform_indices = @transform_14, window_bounds = array<i64: 128, 256>}, {pipeline_mode = #tpu.pipeline_mode<synchronous>, transform_indices = @transform_15, window_bounds = array<i64: 1, 256>}, {pipeline_mode = #tpu.pipeline_mode<synchronous>, transform_indices = @transform_16, window_bounds = array<i64: 256, 128>}, {pipeline_mode = #tpu.pipeline_mode<synchronous>, transform_indices = @transform_17, window_bounds = array<i64: 1, 128>}, {transform_indices = @transform_18, window_bounds = array<i64: 2, 8, 128>}]} {
    %c0 = arith.constant 0 : index
    %c0_0 = arith.constant 0 : index
    %c0_1 = arith.constant 0 : index
    %0 = vector.load %arg1[%c0, %c0_0, %c0_1] : memref<2x8x128xf32, #tpu.memory_space<vmem>>, vector<2x8x128xf32>
    %1 = vector.shape_cast %0 : vector<2x8x128xf32> to vector<16x128xf32>
    %c0_2 = arith.constant 0 : index
    %c0_3 = arith.constant 0 : index
    %c0_4 = arith.constant 0 : index
    %2 = vector.load %arg2[%c0_2, %c0_3, %c0_4] : memref<2x1x8xf32, #tpu.memory_space<vmem>>, vector<2x1x8xf32>
    %c0_5 = arith.constant 0 : index
    %c0_6 = arith.constant 0 : index
    %3 = vector.load %arg3[%c0_5, %c0_6] : memref<1x128xf32, #tpu.memory_space<vmem>>, vector<1x128xf32>
    %c0_7 = arith.constant 0 : index
    %c0_8 = arith.constant 0 : index
    %4 = vector.load %arg4[%c0_7, %c0_8] : memref<1x128xf32, #tpu.memory_space<vmem>>, vector<1x128xf32>
    %cst = arith.constant dense<0.000000e+00> : vector<16xf32>
    %5 = vector.multi_reduction <add>, %1, %cst [1] : vector<16x128xf32> to vector<16xf32>
    %6 = vector.shape_cast %5 : vector<16xf32> to vector<16x1xf32>
    %cst_9 = arith.constant 1.280000e+02 : f32
    %7 = vector.broadcast %cst_9 : f32 to vector<16x1xf32>
    %8 = arith.divf %6, %7 : vector<16x1xf32>
    %9 = arith.mulf %1, %1 : vector<16x128xf32>
    %cst_10 = arith.constant dense<0.000000e+00> : vector<16xf32>
    %10 = vector.multi_reduction <add>, %9, %cst_10 [1] : vector<16x128xf32> to vector<16xf32>
    %11 = vector.shape_cast %10 : vector<16xf32> to vector<16x1xf32>
    %cst_11 = arith.constant 1.280000e+02 : f32
    %12 = vector.broadcast %cst_11 : f32 to vector<16x1xf32>
    %13 = arith.divf %11, %12 : vector<16x1xf32>
    %14 = arith.mulf %8, %8 : vector<16x1xf32>
    %15 = arith.subf %13, %14 : vector<16x1xf32>
    %16 = vector.broadcast %8 : vector<16x1xf32> to vector<16x128xf32>
    %17 = arith.subf %1, %16 : vector<16x128xf32>
    %cst_12 = arith.constant 9.99999997E-7 : f32
    %18 = vector.broadcast %cst_12 : f32 to vector<16x1xf32>
    %19 = arith.addf %15, %18 : vector<16x1xf32>
    %20 = math.rsqrt %19 : vector<16x1xf32>
    %21 = vector.broadcast %20 : vector<16x1xf32> to vector<16x128xf32>
    %22 = vector.broadcast %3 : vector<1x128xf32> to vector<16x128xf32>
    %23 = arith.mulf %21, %22 : vector<16x128xf32>
    %24 = arith.mulf %17, %23 : vector<16x128xf32>
    %25 = vector.broadcast %4 : vector<1x128xf32> to vector<16x128xf32>
    %26 = arith.addf %24, %25 : vector<16x128xf32>
    %27 = arith.truncf %26 : vector<16x128xf32> to vector<16x128xbf16>
    %c0_13 = arith.constant 0 : index
    %c0_14 = arith.constant 0 : index
    %28 = vector.load %arg5[%c0_13, %c0_14] : memref<128x128xbf16, #tpu.memory_space<vmem>>, vector<128x128xbf16>
    %cst_15 = arith.constant dense<0.000000e+00> : vector<16x128xf32>
    %29 = tpu.matmul %27, %28, %cst_15 {dimension_numbers = #tpu.dot_dimension_numbers<[1], [0], [0], [1], [0, 0, 1, 1], [], []>} : vector<16x128xbf16>, vector<128x128xbf16>, vector<16x128xf32> -> vector<16x128xf32>
    %c0_16 = arith.constant 0 : index
    %c0_17 = arith.constant 0 : index
    %30 = vector.load %arg6[%c0_16, %c0_17] : memref<1x128xf32, #tpu.memory_space<vmem>>, vector<1x128xf32>
    %31 = vector.broadcast %30 : vector<1x128xf32> to vector<16x128xf32>
    %32 = arith.addf %29, %31 : vector<16x128xf32>
    %c0_18 = arith.constant 0 : index
    %c0_19 = arith.constant 0 : index
    %33 = vector.load %arg7[%c0_18, %c0_19] : memref<128x128xbf16, #tpu.memory_space<vmem>>, vector<128x128xbf16>
    %cst_20 = arith.constant dense<0.000000e+00> : vector<16x128xf32>
    %34 = tpu.matmul %27, %33, %cst_20 {dimension_numbers = #tpu.dot_dimension_numbers<[1], [0], [0], [1], [0, 0, 1, 1], [], []>} : vector<16x128xbf16>, vector<128x128xbf16>, vector<16x128xf32> -> vector<16x128xf32>
    %c0_21 = arith.constant 0 : index
    %c0_22 = arith.constant 0 : index
    %35 = vector.load %arg8[%c0_21, %c0_22] : memref<1x128xf32, #tpu.memory_space<vmem>>, vector<1x128xf32>
    %36 = vector.broadcast %35 : vector<1x128xf32> to vector<16x128xf32>
    %37 = arith.addf %34, %36 : vector<16x128xf32>
    %c0_23 = arith.constant 0 : index
    %c0_24 = arith.constant 0 : index
    %38 = vector.load %arg9[%c0_23, %c0_24] : memref<128x128xbf16, #tpu.memory_space<vmem>>, vector<128x128xbf16>
    %cst_25 = arith.constant dense<0.000000e+00> : vector<16x128xf32>
    %39 = tpu.matmul %27, %38, %cst_25 {dimension_numbers = #tpu.dot_dimension_numbers<[1], [0], [0], [1], [0, 0, 1, 1], [], []>} : vector<16x128xbf16>, vector<128x128xbf16>, vector<16x128xf32> -> vector<16x128xf32>
    %c0_26 = arith.constant 0 : index
    %c0_27 = arith.constant 0 : index
    %40 = vector.load %arg10[%c0_26, %c0_27] : memref<1x128xf32, #tpu.memory_space<vmem>>, vector<1x128xf32>
    %41 = vector.broadcast %40 : vector<1x128xf32> to vector<16x128xf32>
    %42 = arith.addf %39, %41 : vector<16x128xf32>
    %cst_28 = arith.constant 0.176776692 : f32
    %43 = vector.broadcast %cst_28 : f32 to vector<16x128xf32>
    %44 = arith.mulf %32, %43 : vector<16x128xf32>
    %45 = arith.truncf %44 : vector<16x128xf32> to vector<16x128xbf16>
    %46 = vector.shape_cast %45 : vector<16x128xbf16> to vector<2x8x128xbf16>
    %47 = arith.truncf %37 : vector<16x128xf32> to vector<16x128xbf16>
    %48 = vector.shape_cast %47 : vector<16x128xbf16> to vector<2x8x128xbf16>
    %49 = arith.truncf %42 : vector<16x128xf32> to vector<16x128xbf16>
    %50 = vector.shape_cast %49 : vector<16x128xbf16> to vector<2x8x128xbf16>
    %51 = vector.extract_strided_slice %46 {offsets = [0, 0, 0], sizes = [2, 8, 32], strides = [1, 1, 1]} : vector<2x8x128xbf16> to vector<2x8x32xbf16>
    %52 = vector.extract_strided_slice %48 {offsets = [0, 0, 0], sizes = [2, 8, 32], strides = [1, 1, 1]} : vector<2x8x128xbf16> to vector<2x8x32xbf16>
    %53 = vector.extract_strided_slice %50 {offsets = [0, 0, 0], sizes = [2, 8, 32], strides = [1, 1, 1]} : vector<2x8x128xbf16> to vector<2x8x32xbf16>
    "tpu.trace_start"() <{level = 10 : i32, message = "bqd,bkd->bqk"}> : () -> ()
    %cst_29 = arith.constant dense<0.000000e+00> : vector<2x8x8xf32>
    %54 = tpu.matmul %51, %52, %cst_29 {dimension_numbers = #tpu.dot_dimension_numbers<[2], [2], [1], [1], [0, 0, 0, 1, 1, 1], [0], [0]>} : vector<2x8x32xbf16>, vector<2x8x32xbf16>, vector<2x8x8xf32> -> vector<2x8x8xf32>
    "tpu.trace_stop"() : () -> ()
    %55 = vector.broadcast %2 : vector<2x1x8xf32> to vector<2x8x8xf32>
    %56 = arith.addf %54, %55 : vector<2x8x8xf32>
    %cst_30 = arith.constant dense<0xFF800000> : vector<2x8xf32>
    %57 = vector.multi_reduction <maximumf>, %56, %cst_30 [2] : vector<2x8x8xf32> to vector<2x8xf32>
    %58 = vector.shape_cast %57 : vector<2x8xf32> to vector<2x8x1xf32>
    %59 = vector.broadcast %58 : vector<2x8x1xf32> to vector<2x8x8xf32>
    %60 = arith.subf %56, %59 : vector<2x8x8xf32>
    %61 = math.exp %60 : vector<2x8x8xf32>
    %cst_31 = arith.constant dense<0.000000e+00> : vector<2x8xf32>
    %62 = vector.multi_reduction <add>, %61, %cst_31 [2] : vector<2x8x8xf32> to vector<2x8xf32>
    %63 = vector.shape_cast %62 : vector<2x8xf32> to vector<2x8x1xf32>
    %64 = tpu.reciprocal %63 {approx = true} : vector<2x8x1xf32> -> vector<2x8x1xf32>
    %65 = vector.broadcast %64 : vector<2x8x1xf32> to vector<2x8x8xf32>
    %66 = arith.mulf %61, %65 : vector<2x8x8xf32>
    %67 = arith.truncf %66 : vector<2x8x8xf32> to vector<2x8x8xbf16>
    "tpu.trace_start"() <{level = 10 : i32, message = "bqk,bkd->bqd"}> : () -> ()
    %cst_32 = arith.constant dense<0.000000e+00> : vector<2x8x32xf32>
    %68 = tpu.matmul %67, %53, %cst_32 {dimension_numbers = #tpu.dot_dimension_numbers<[2], [1], [1], [2], [0, 0, 0, 1, 1, 2], [0], [0]>} : vector<2x8x8xbf16>, vector<2x8x32xbf16>, vector<2x8x32xf32> -> vector<2x8x32xf32>
    "tpu.trace_stop"() : () -> ()
    %c0_33 = arith.constant 0 : index
    %c0_34 = arith.constant 0 : index
    %c0_35 = arith.constant 0 : index
    %69 = vector.load %arg20[%c0_33, %c0_34, %c0_35] : memref<2x8x128xf32, #tpu.memory_space<vmem>>, vector<2x8x32xf32>
    tpu.vector_store %arg20[%c0_33, %c0_34, %c0_35], %68 {strides = array<i32>} : memref<2x8x128xf32, #tpu.memory_space<vmem>>, vector<2x8x32xf32>,
    %70 = vector.extract_strided_slice %46 {offsets = [0, 0, 32], sizes = [2, 8, 32], strides = [1, 1, 1]} : vector<2x8x128xbf16> to vector<2x8x32xbf16>
    %71 = vector.extract_strided_slice %48 {offsets = [0, 0, 32], sizes = [2, 8, 32], strides = [1, 1, 1]} : vector<2x8x128xbf16> to vector<2x8x32xbf16>
    %72 = vector.extract_strided_slice %50 {offsets = [0, 0, 32], sizes = [2, 8, 32], strides = [1, 1, 1]} : vector<2x8x128xbf16> to vector<2x8x32xbf16>
    "tpu.trace_start"() <{level = 10 : i32, message = "bqd,bkd->bqk"}> : () -> ()
    %cst_36 = arith.constant dense<0.000000e+00> : vector<2x8x8xf32>
    %73 = tpu.matmul %70, %71, %cst_36 {dimension_numbers = #tpu.dot_dimension_numbers<[2], [2], [1], [1], [0, 0, 0, 1, 1, 1], [0], [0]>} : vector<2x8x32xbf16>, vector<2x8x32xbf16>, vector<2x8x8xf32> -> vector<2x8x8xf32>
    "tpu.trace_stop"() : () -> ()
    %74 = vector.broadcast %2 : vector<2x1x8xf32> to vector<2x8x8xf32>
    %75 = arith.addf %73, %74 : vector<2x8x8xf32>
    %cst_37 = arith.constant dense<0xFF800000> : vector<2x8xf32>
    %76 = vector.multi_reduction <maximumf>, %75, %cst_37 [2] : vector<2x8x8xf32> to vector<2x8xf32>
    %77 = vector.shape_cast %76 : vector<2x8xf32> to vector<2x8x1xf32>
    %78 = vector.broadcast %77 : vector<2x8x1xf32> to vector<2x8x8xf32>
    %79 = arith.subf %75, %78 : vector<2x8x8xf32>
    %80 = math.exp %79 : vector<2x8x8xf32>
    %cst_38 = arith.constant dense<0.000000e+00> : vector<2x8xf32>
    %81 = vector.multi_reduction <add>, %80, %cst_38 [2] : vector<2x8x8xf32> to vector<2x8xf32>
    %82 = vector.shape_cast %81 : vector<2x8xf32> to vector<2x8x1xf32>
    %83 = tpu.reciprocal %82 {approx = true} : vector<2x8x1xf32> -> vector<2x8x1xf32>
    %84 = vector.broadcast %83 : vector<2x8x1xf32> to vector<2x8x8xf32>
    %85 = arith.mulf %80, %84 : vector<2x8x8xf32>
    %86 = arith.truncf %85 : vector<2x8x8xf32> to vector<2x8x8xbf16>
    "tpu.trace_start"() <{level = 10 : i32, message = "bqk,bkd->bqd"}> : () -> ()
    %cst_39 = arith.constant dense<0.000000e+00> : vector<2x8x32xf32>
    %87 = tpu.matmul %86, %72, %cst_39 {dimension_numbers = #tpu.dot_dimension_numbers<[2], [1], [1], [2], [0, 0, 0, 1, 1, 2], [0], [0]>} : vector<2x8x8xbf16>, vector<2x8x32xbf16>, vector<2x8x32xf32> -> vector<2x8x32xf32>
    "tpu.trace_stop"() : () -> ()
    %c0_40 = arith.constant 0 : index
    %c0_41 = arith.constant 0 : index
    %c32 = arith.constant 32 : index
    %88 = vector.load %arg20[%c0_40, %c0_41, %c32] : memref<2x8x128xf32, #tpu.memory_space<vmem>>, vector<2x8x32xf32>
    tpu.vector_store %arg20[%c0_40, %c0_41, %c32], %87 {strides = array<i32>} : memref<2x8x128xf32, #tpu.memory_space<vmem>>, vector<2x8x32xf32>,
    %89 = vector.extract_strided_slice %46 {offsets = [0, 0, 64], sizes = [2, 8, 32], strides = [1, 1, 1]} : vector<2x8x128xbf16> to vector<2x8x32xbf16>
    %90 = vector.extract_strided_slice %48 {offsets = [0, 0, 64], sizes = [2, 8, 32], strides = [1, 1, 1]} : vector<2x8x128xbf16> to vector<2x8x32xbf16>
    %91 = vector.extract_strided_slice %50 {offsets = [0, 0, 64], sizes = [2, 8, 32], strides = [1, 1, 1]} : vector<2x8x128xbf16> to vector<2x8x32xbf16>
    "tpu.trace_start"() <{level = 10 : i32, message = "bqd,bkd->bqk"}> : () -> ()
    %cst_42 = arith.constant dense<0.000000e+00> : vector<2x8x8xf32>
    %92 = tpu.matmul %89, %90, %cst_42 {dimension_numbers = #tpu.dot_dimension_numbers<[2], [2], [1], [1], [0, 0, 0, 1, 1, 1], [0], [0]>} : vector<2x8x32xbf16>, vector<2x8x32xbf16>, vector<2x8x8xf32> -> vector<2x8x8xf32>
    "tpu.trace_stop"() : () -> ()
    %93 = vector.broadcast %2 : vector<2x1x8xf32> to vector<2x8x8xf32>
    %94 = arith.addf %92, %93 : vector<2x8x8xf32>
    %cst_43 = arith.constant dense<0xFF800000> : vector<2x8xf32>
    %95 = vector.multi_reduction <maximumf>, %94, %cst_43 [2] : vector<2x8x8xf32> to vector<2x8xf32>
    %96 = vector.shape_cast %95 : vector<2x8xf32> to vector<2x8x1xf32>
    %97 = vector.broadcast %96 : vector<2x8x1xf32> to vector<2x8x8xf32>
    %98 = arith.subf %94, %97 : vector<2x8x8xf32>
    %99 = math.exp %98 : vector<2x8x8xf32>
    %cst_44 = arith.constant dense<0.000000e+00> : vector<2x8xf32>
    %100 = vector.multi_reduction <add>, %99, %cst_44 [2] : vector<2x8x8xf32> to vector<2x8xf32>
    %101 = vector.shape_cast %100 : vector<2x8xf32> to vector<2x8x1xf32>
    %102 = tpu.reciprocal %101 {approx = true} : vector<2x8x1xf32> -> vector<2x8x1xf32>
    %103 = vector.broadcast %102 : vector<2x8x1xf32> to vector<2x8x8xf32>
    %104 = arith.mulf %99, %103 : vector<2x8x8xf32>
    %105 = arith.truncf %104 : vector<2x8x8xf32> to vector<2x8x8xbf16>
    "tpu.trace_start"() <{level = 10 : i32, message = "bqk,bkd->bqd"}> : () -> ()
    %cst_45 = arith.constant dense<0.000000e+00> : vector<2x8x32xf32>
    %106 = tpu.matmul %105, %91, %cst_45 {dimension_numbers = #tpu.dot_dimension_numbers<[2], [1], [1], [2], [0, 0, 0, 1, 1, 2], [0], [0]>} : vector<2x8x8xbf16>, vector<2x8x32xbf16>, vector<2x8x32xf32> -> vector<2x8x32xf32>
    "tpu.trace_stop"() : () -> ()
    %c0_46 = arith.constant 0 : index
    %c0_47 = arith.constant 0 : index
    %c64 = arith.constant 64 : index
    %107 = vector.load %arg20[%c0_46, %c0_47, %c64] : memref<2x8x128xf32, #tpu.memory_space<vmem>>, vector<2x8x32xf32>
    tpu.vector_store %arg20[%c0_46, %c0_47, %c64], %106 {strides = array<i32>} : memref<2x8x128xf32, #tpu.memory_space<vmem>>, vector<2x8x32xf32>,
    %108 = vector.extract_strided_slice %46 {offsets = [0, 0, 96], sizes = [2, 8, 32], strides = [1, 1, 1]} : vector<2x8x128xbf16> to vector<2x8x32xbf16>
    %109 = vector.extract_strided_slice %48 {offsets = [0, 0, 96], sizes = [2, 8, 32], strides = [1, 1, 1]} : vector<2x8x128xbf16> to vector<2x8x32xbf16>
    %110 = vector.extract_strided_slice %50 {offsets = [0, 0, 96], sizes = [2, 8, 32], strides = [1, 1, 1]} : vector<2x8x128xbf16> to vector<2x8x32xbf16>
    "tpu.trace_start"() <{level = 10 : i32, message = "bqd,bkd->bqk"}> : () -> ()
    %cst_48 = arith.constant dense<0.000000e+00> : vector<2x8x8xf32>
    %111 = tpu.matmul %108, %109, %cst_48 {dimension_numbers = #tpu.dot_dimension_numbers<[2], [2], [1], [1], [0, 0, 0, 1, 1, 1], [0], [0]>} : vector<2x8x32xbf16>, vector<2x8x32xbf16>, vector<2x8x8xf32> -> vector<2x8x8xf32>
    "tpu.trace_stop"() : () -> ()
    %112 = vector.broadcast %2 : vector<2x1x8xf32> to vector<2x8x8xf32>
    %113 = arith.addf %111, %112 : vector<2x8x8xf32>
    %cst_49 = arith.constant dense<0xFF800000> : vector<2x8xf32>
    %114 = vector.multi_reduction <maximumf>, %113, %cst_49 [2] : vector<2x8x8xf32> to vector<2x8xf32>
    %115 = vector.shape_cast %114 : vector<2x8xf32> to vector<2x8x1xf32>
    %116 = vector.broadcast %115 : vector<2x8x1xf32> to vector<2x8x8xf32>
    %117 = arith.subf %113, %116 : vector<2x8x8xf32>
    %118 = math.exp %117 : vector<2x8x8xf32>
    %cst_50 = arith.constant dense<0.000000e+00> : vector<2x8xf32>
    %119 = vector.multi_reduction <add>, %118, %cst_50 [2] : vector<2x8x8xf32> to vector<2x8xf32>
    %120 = vector.shape_cast %119 : vector<2x8xf32> to vector<2x8x1xf32>
    %121 = tpu.reciprocal %120 {approx = true} : vector<2x8x1xf32> -> vector<2x8x1xf32>
    %122 = vector.broadcast %121 : vector<2x8x1xf32> to vector<2x8x8xf32>
    %123 = arith.mulf %118, %122 : vector<2x8x8xf32>
    %124 = arith.truncf %123 : vector<2x8x8xf32> to vector<2x8x8xbf16>
    "tpu.trace_start"() <{level = 10 : i32, message = "bqk,bkd->bqd"}> : () -> ()
    %cst_51 = arith.constant dense<0.000000e+00> : vector<2x8x32xf32>
    %125 = tpu.matmul %124, %110, %cst_51 {dimension_numbers = #tpu.dot_dimension_numbers<[2], [1], [1], [2], [0, 0, 0, 1, 1, 2], [0], [0]>} : vector<2x8x8xbf16>, vector<2x8x32xbf16>, vector<2x8x32xf32> -> vector<2x8x32xf32>
    "tpu.trace_stop"() : () -> ()
    %c0_52 = arith.constant 0 : index
    %c0_53 = arith.constant 0 : index
    %c96 = arith.constant 96 : index
    %126 = vector.load %arg20[%c0_52, %c0_53, %c96] : memref<2x8x128xf32, #tpu.memory_space<vmem>>, vector<2x8x32xf32>
    tpu.vector_store %arg20[%c0_52, %c0_53, %c96], %125 {strides = array<i32>} : memref<2x8x128xf32, #tpu.memory_space<vmem>>, vector<2x8x32xf32>,
    %c0_54 = arith.constant 0 : index
    %c0_55 = arith.constant 0 : index
    %c0_56 = arith.constant 0 : index
    %127 = vector.load %arg20[%c0_54, %c0_55, %c0_56] : memref<2x8x128xf32, #tpu.memory_space<vmem>>, vector<2x8x128xf32>
    %128 = vector.shape_cast %127 : vector<2x8x128xf32> to vector<16x128xf32>
    %129 = arith.truncf %128 : vector<16x128xf32> to vector<16x128xbf16>
    %c0_57 = arith.constant 0 : index
    %c0_58 = arith.constant 0 : index
    %130 = vector.load %arg11[%c0_57, %c0_58] : memref<128x128xbf16, #tpu.memory_space<vmem>>, vector<128x128xbf16>
    %cst_59 = arith.constant dense<0.000000e+00> : vector<16x128xf32>
    %131 = tpu.matmul %129, %130, %cst_59 {dimension_numbers = #tpu.dot_dimension_numbers<[1], [0], [0], [1], [0, 0, 1, 1], [], []>} : vector<16x128xbf16>, vector<128x128xbf16>, vector<16x128xf32> -> vector<16x128xf32>
    %c0_60 = arith.constant 0 : index
    %c0_61 = arith.constant 0 : index
    %132 = vector.load %arg12[%c0_60, %c0_61] : memref<1x128xf32, #tpu.memory_space<vmem>>, vector<1x128xf32>
    %133 = vector.broadcast %132 : vector<1x128xf32> to vector<16x128xf32>
    %134 = arith.addf %131, %133 : vector<16x128xf32>
    %135 = arith.addf %1, %134 : vector<16x128xf32>
    %c0_62 = arith.constant 0 : index
    %c0_63 = arith.constant 0 : index
    %136 = vector.load %arg13[%c0_62, %c0_63] : memref<1x128xf32, #tpu.memory_space<vmem>>, vector<1x128xf32>
    %c0_64 = arith.constant 0 : index
    %c0_65 = arith.constant 0 : index
    %137 = vector.load %arg14[%c0_64, %c0_65] : memref<1x128xf32, #tpu.memory_space<vmem>>, vector<1x128xf32>
    %cst_66 = arith.constant dense<0.000000e+00> : vector<16xf32>
    %138 = vector.multi_reduction <add>, %135, %cst_66 [1] : vector<16x128xf32> to vector<16xf32>
    %139 = vector.shape_cast %138 : vector<16xf32> to vector<16x1xf32>
    %cst_67 = arith.constant 1.280000e+02 : f32
    %140 = vector.broadcast %cst_67 : f32 to vector<16x1xf32>
    %141 = arith.divf %139, %140 : vector<16x1xf32>
    %142 = arith.mulf %135, %135 : vector<16x128xf32>
    %cst_68 = arith.constant dense<0.000000e+00> : vector<16xf32>
    %143 = vector.multi_reduction <add>, %142, %cst_68 [1] : vector<16x128xf32> to vector<16xf32>
    %144 = vector.shape_cast %143 : vector<16xf32> to vector<16x1xf32>
    %cst_69 = arith.constant 1.280000e+02 : f32
    %145 = vector.broadcast %cst_69 : f32 to vector<16x1xf32>
    %146 = arith.divf %144, %145 : vector<16x1xf32>
    %147 = arith.mulf %141, %141 : vector<16x1xf32>
    %148 = arith.subf %146, %147 : vector<16x1xf32>
    %149 = vector.broadcast %141 : vector<16x1xf32> to vector<16x128xf32>
    %150 = arith.subf %135, %149 : vector<16x128xf32>
    %cst_70 = arith.constant 9.99999997E-7 : f32
    %151 = vector.broadcast %cst_70 : f32 to vector<16x1xf32>
    %152 = arith.addf %148, %151 : vector<16x1xf32>
    %153 = math.rsqrt %152 : vector<16x1xf32>
    %154 = vector.broadcast %153 : vector<16x1xf32> to vector<16x128xf32>
    %155 = vector.broadcast %136 : vector<1x128xf32> to vector<16x128xf32>
    %156 = arith.mulf %154, %155 : vector<16x128xf32>
    %157 = arith.mulf %150, %156 : vector<16x128xf32>
    %158 = vector.broadcast %137 : vector<1x128xf32> to vector<16x128xf32>
    %159 = arith.addf %157, %158 : vector<16x128xf32>
    %160 = arith.truncf %159 : vector<16x128xf32> to vector<16x128xbf16>
    %c0_71 = arith.constant 0 : index
    %c0_72 = arith.constant 0 : index
    %161 = vector.load %arg15[%c0_71, %c0_72] : memref<128x256xbf16, #tpu.memory_space<vmem>>, vector<128x256xbf16>
    %cst_73 = arith.constant dense<0.000000e+00> : vector<16x256xf32>
    %162 = tpu.matmul %160, %161, %cst_73 {dimension_numbers = #tpu.dot_dimension_numbers<[1], [0], [0], [1], [0, 0, 1, 1], [], []>} : vector<16x128xbf16>, vector<128x256xbf16>, vector<16x256xf32> -> vector<16x256xf32>
    %c0_74 = arith.constant 0 : index
    %c0_75 = arith.constant 0 : index
    %163 = vector.load %arg16[%c0_74, %c0_75] : memref<1x256xf32, #tpu.memory_space<vmem>>, vector<1x256xf32>
    %164 = vector.broadcast %163 : vector<1x256xf32> to vector<16x256xf32>
    %165 = arith.addf %162, %164 : vector<16x256xf32>
    %cst_76 = arith.constant 0.000000e+00 : f32
    %166 = vector.broadcast %cst_76 : f32 to vector<16x256xf32>
    %167 = arith.maximumf %165, %166 : vector<16x256xf32>
    %168 = arith.truncf %167 : vector<16x256xf32> to vector<16x256xbf16>
    %c0_77 = arith.constant 0 : index
    %c0_78 = arith.constant 0 : index
    %169 = vector.load %arg17[%c0_77, %c0_78] : memref<256x128xbf16, #tpu.memory_space<vmem>>, vector<256x128xbf16>
    %cst_79 = arith.constant dense<0.000000e+00> : vector<16x128xf32>
    %170 = tpu.matmul %168, %169, %cst_79 {dimension_numbers = #tpu.dot_dimension_numbers<[1], [0], [0], [1], [0, 0, 1, 1], [], []>} : vector<16x256xbf16>, vector<256x128xbf16>, vector<16x128xf32> -> vector<16x128xf32>
    %c0_80 = arith.constant 0 : index
    %c0_81 = arith.constant 0 : index
    %171 = vector.load %arg18[%c0_80, %c0_81] : memref<1x128xf32, #tpu.memory_space<vmem>>, vector<1x128xf32>
    %172 = vector.broadcast %171 : vector<1x128xf32> to vector<16x128xf32>
    %173 = arith.addf %170, %172 : vector<16x128xf32>
    %174 = arith.addf %135, %173 : vector<16x128xf32>
    %175 = vector.shape_cast %174 : vector<16x128xf32> to vector<2x8x128xf32>
    %c0_82 = arith.constant 0 : index
    %c0_83 = arith.constant 0 : index
    %c0_84 = arith.constant 0 : index
    %176 = vector.load %arg19[%c0_82, %c0_83, %c0_84] : memref<2x8x128xf32, #tpu.memory_space<vmem>>, vector<2x8x128xf32>
    tpu.vector_store %arg19[%c0_82, %c0_83, %c0_84], %175 {strides = array<i32>} : memref<2x8x128xf32, #tpu.memory_space<vmem>>, vector<2x8x128xf32>,
    return
  }
  func.func @transform_0(%arg0: i32) -> (i32, i32, i32) {
    %c0_i32 = arith.constant 0 : i32
    %c0_i32_0 = arith.constant 0 : i32
    %c0_i32_1 = arith.constant 0 : i32
    return %arg0, %c0_i32, %c0_i32_0 : i32, i32, i32
  }
  func.func @transform_1(%arg0: i32) -> (i32, i32, i32) {
    %c0_i32 = arith.constant 0 : i32
    %c0_i32_0 = arith.constant 0 : i32
    %c0_i32_1 = arith.constant 0 : i32
    return %arg0, %c0_i32, %c0_i32_0 : i32, i32, i32
  }
  func.func @transform_2(%arg0: i32) -> (i32, i32) {
    %c0_i32 = arith.constant 0 : i32
    %c0_i32_0 = arith.constant 0 : i32
    %c0_i32_1 = arith.constant 0 : i32
    return %c0_i32, %c0_i32_0 : i32, i32
  }
  func.func @transform_3(%arg0: i32) -> (i32, i32) {
    %c0_i32 = arith.constant 0 : i32
    %c0_i32_0 = arith.constant 0 : i32
    %c0_i32_1 = arith.constant 0 : i32
    return %c0_i32, %c0_i32_0 : i32, i32
  }
  func.func @transform_4(%arg0: i32) -> (i32, i32) {
    %c0_i32 = arith.constant 0 : i32
    %c0_i32_0 = arith.constant 0 : i32
    %c0_i32_1 = arith.constant 0 : i32
    return %c0_i32, %c0_i32_0 : i32, i32
  }
  func.func @transform_5(%arg0: i32) -> (i32, i32) {
    %c0_i32 = arith.constant 0 : i32
    %c0_i32_0 = arith.constant 0 : i32
    %c0_i32_1 = arith.constant 0 : i32
    return %c0_i32, %c0_i32_0 : i32, i32
  }
  func.func @transform_6(%arg0: i32) -> (i32, i32) {
    %c0_i32 = arith.constant 0 : i32
    %c0_i32_0 = arith.constant 0 : i32
    %c0_i32_1 = arith.constant 0 : i32
    return %c0_i32, %c0_i32_0 : i32, i32
  }
  func.func @transform_7(%arg0: i32) -> (i32, i32) {
    %c0_i32 = arith.constant 0 : i32
    %c0_i32_0 = arith.constant 0 : i32
    %c0_i32_1 = arith.constant 0 : i32
    return %c0_i32, %c0_i32_0 : i32, i32
  }
  func.func @transform_8(%arg0: i32) -> (i32, i32) {
    %c0_i32 = arith.constant 0 : i32
    %c0_i32_0 = arith.constant 0 : i32
    %c0_i32_1 = arith.constant 0 : i32
    return %c0_i32, %c0_i32_0 : i32, i32
  }
  func.func @transform_9(%arg0: i32) -> (i32, i32) {
    %c0_i32 = arith.constant 0 : i32
    %c0_i32_0 = arith.constant 0 : i32
    %c0_i32_1 = arith.constant 0 : i32
    return %c0_i32, %c0_i32_0 : i32, i32
  }
  func.func @transform_10(%arg0: i32) -> (i32, i32) {
    %c0_i32 = arith.constant 0 : i32
    %c0_i32_0 = arith.constant 0 : i32
    %c0_i32_1 = arith.constant 0 : i32
    return %c0_i32, %c0_i32_0 : i32, i32
  }
  func.func @transform_11(%arg0: i32) -> (i32, i32) {
    %c0_i32 = arith.constant 0 : i32
    %c0_i32_0 = arith.constant 0 : i32
    %c0_i32_1 = arith.constant 0 : i32
    return %c0_i32, %c0_i32_0 : i32, i32
  }
  func.func @transform_12(%arg0: i32) -> (i32, i32) {
    %c0_i32 = arith.constant 0 : i32
    %c0_i32_0 = arith.constant 0 : i32
    %c0_i32_1 = arith.constant 0 : i32
    return %c0_i32, %c0_i32_0 : i32, i32
  }
  func.func @transform_13(%arg0: i32) -> (i32, i32) {
    %c0_i32 = arith.constant 0 : i32
    %c0_i32_0 = arith.constant 0 : i32
    %c0_i32_1 = arith.constant 0 : i32
    return %c0_i32, %c0_i32_0 : i32, i32
  }
  func.func @transform_14(%arg0: i32) -> (i32, i32) {
    %c0_i32 = arith.constant 0 : i32
    %c0_i32_0 = arith.constant 0 : i32
    %c0_i32_1 = arith.constant 0 : i32
    return %c0_i32, %c0_i32_0 : i32, i32
  }
  func.func @transform_15(%arg0: i32) -> (i32, i32) {
    %c0_i32 = arith.constant 0 : i32
    %c0_i32_0 = arith.constant 0 : i32
    %c0_i32_1 = arith.constant 0 : i32
    return %c0_i32, %c0_i32_0 : i32, i32
  }
  func.func @transform_16(%arg0: i32) -> (i32, i32) {
    %c0_i32 = arith.constant 0 : i32
    %c0_i32_0 = arith.constant 0 : i32
    %c0_i32_1 = arith.constant 0 : i32
    return %c0_i32, %c0_i32_0 : i32, i32
  }
  func.func @transform_17(%arg0: i32) -> (i32, i32) {
    %c0_i32 = arith.constant 0 : i32
    %c0_i32_0 = arith.constant 0 : i32
    %c0_i32_1 = arith.constant 0 : i32
    return %c0_i32, %c0_i32_0 : i32, i32
  }
  func.func @transform_18(%arg0: i32) -> (i32, i32, i32) {
    %c0_i32 = arith.constant 0 : i32
    %c0_i32_0 = arith.constant 0 : i32
    %c0_i32_1 = arith.constant 0 : i32
    return %arg0, %c0_i32, %c0_i32_0 : i32, i32, i32
  }
}

</mosaic_0001>

<bundles_post_ra>
// kernel: tpu_custom_call.1
= control target key start
LH: loop header
LB: loop body
LE: loop exit
PB: predicated region body
PF: predicated region fallthrough
CT: control target
= control target key end

     0   :  { %s2492_s0 = inlined_call_operand.hbm [shape: f32[2,8,128], index: 0, kind: input, shape index: {}]   ;;  %s2493_s1 = inlined_call_operand.hbm [shape: f32[2,1,8], index: 1, kind: input, shape index: {}]   ;;  %s2494_s2 = inlined_call_operand.vmem [shape: f32[1,128], index: 2, kind: input, shape index: {}]   ;;  %s2495_s3 = inlined_call_operand.hbm [shape: f32[1,128], index: 3, kind: input, shape index: {}]   ;;  %s2496_s4 = inlined_call_operand.hbm [shape: bf16[128,128], index: 4, kind: input, shape index: {}]   ;;  %s2497_s5 = inlined_call_operand.vmem [shape: f32[1,128], index: 5, kind: input, shape index: {}]   ;;  %s2498_s6 = inlined_call_operand.hbm [shape: bf16[128,128], index: 6, kind: input, shape index: {}]   ;;  %s2499_s7 = inlined_call_operand.vmem [shape: f32[1,128], index: 7, kind: input, shape index: {}]   ;;  %s2500_s8 = inlined_call_operand.hbm [shape: bf16[128,128], index: 8, kind: input, shape index: {}]   ;;  %s2501_s9 = inlined_call_operand.vmem [shape: f32[1,128], index: 9, kind: input, shape index: {}]   ;;  %s2502_s10 = inlined_call_operand.hbm [shape: bf16[128,128], index: 10, kind: input, shape index: {}]   ;;  %s2503_s11 = inlined_call_operand.vmem [shape: f32[1,128], index: 11, kind: input, shape index: {}]   ;;  %s2504_s12 = inlined_call_operand.vmem [shape: f32[1,128], index: 12, kind: input, shape index: {}]   ;;  %s2505_s13 = inlined_call_operand.vmem [shape: f32[1,128], index: 13, kind: input, shape index: {}]   ;;  %s2506_s14 = inlined_call_operand.hbm [shape: bf16[128,256], index: 14, kind: input, shape index: {}]   ;;  %s2507_s15 = inlined_call_operand.vmem [shape: f32[1,256], index: 15, kind: input, shape index: {}]   ;;  %s2508_s16 = inlined_call_operand.hbm [shape: bf16[256,128], index: 16, kind: input, shape index: {}]   ;;  %s2509_s17 = inlined_call_operand.vmem [shape: f32[1,128], index: 17, kind: input, shape index: {}]   ;;  %s2510_s18 = inlined_call_operand.hbm [shape: f32[2,8,128], index: 18, kind: output, shape index: {}]  }
   0x1   :  { %2511 = sst [smem:[#allocation25_spill]] %s2492_s0 }
   0x2   :  { %2512 = sst [smem:[#allocation26_spill]] %s2493_s1 }
   0x3   :  { %2513 = sst [smem:[#allocation27_spill]] %s2494_s2 }
   0x4   :  { %23 = vsyncpa [#allocation4], 0 }
   0x5   :  { %24 = vsyncpa [#allocation7], 0 }
   0x6   :  { %25 = vsyncpa [#allocation10], 0 }
   0x7   :  { %26 = vsyncpa [#allocation13], 0 }
   0x8   :  { %27 = vsyncpa [#allocation16], 0  ;;  %s2514_s29 = sld [smem:[#allocation26_spill]] }
   0xe   :  { %s46_s30 = sshll.u32 %s2514_s29, 4  ;;  %s47_s30 = int_to_ptr.hbm [resolvable:$true] %s46_s30 }
   0xf   :  { %28 = vsyncpa [#allocation5], 0  ;;  %s2146_s0 = smov [#allocation6]   ;;  %s72_s21 = sshll.u32 %s2496_s4, 4  ;;  %s73_s21 = int_to_ptr.hbm [resolvable:$true] %s72_s21 }
  0x10   :  { %s48_s19 = sshll.u32 %s2146_s0, 4  ;;  %s2147_s22 = smov 16   ;;  %s49_s19 = int_to_ptr.vmem [resolvable:$true] %s48_s19 }
  0x11   :  { %s2148_s2 = smov 1   ;;  %s2149_s23 = smov [#allocation9]  }
  0x12   :  { %54 = dma.hbm_to_vmem [thread:$0]  %s47_s30, 32, %s49_s19, [#allocation7], %s2147_s22, %s2147_s22, %s2148_s2  }
  0x13   :  { %s74_s24 = sshll.u32 %s2149_s23, 4  ;;  %s2150_s25 = smov 64   ;;  %s75_s24 = int_to_ptr.vmem [resolvable:$true] %s74_s24 }
  0x14   :  { %s2151_s26 = smov 4   ;;  %s102_s29 = sshll.u32 %s2500_s8, 4  ;;  %s103_s29 = int_to_ptr.hbm [resolvable:$true] %s102_s29 }
  0x15   :  { %80 = dma.hbm_to_vmem [thread:$0]  %s73_s21, 1024, %s75_s24, [#allocation10], %s2150_s25, %s2150_s25, %s2151_s26  }
  0x16   :  { %s2152_s0 = smov [#allocation12]   ;;  %s136_s1 = sshll.u32 %s2506_s14, 4  ;;  %s137_s1 = int_to_ptr.hbm [resolvable:$true] %s136_s1 }
  0x17   :  { %s104_s4 = sshll.u32 %s2152_s0, 4  ;;  %s2153_s20 = smov [#allocation15]   ;;  %s105_s4 = int_to_ptr.vmem [resolvable:$true] %s104_s4 }
  0x18   :  { %110 = dma.hbm_to_vmem [thread:$0]  %s103_s29, 1024, %s105_s4, [#allocation13], %s2150_s25, %s2150_s25, %s2151_s26  }
  0x19   :  { %s138_s22 = sshll.u32 %s2153_s20, 4  ;;  %s2515_s23 = sld [smem:[#allocation25_spill]]  ;;  %s139_s22 = int_to_ptr.vmem [resolvable:$true] %s138_s22 }
  0x1a   :  { %s2154_s8 = smov 128   ;;  %s2155_s27 = smov 8  }
  0x1b   :  { %144 = dma.hbm_to_vmem [thread:$0]  %s137_s1, 2048, %s139_s22, [#allocation16], %s2154_s8, %s2154_s8, %s2155_s27  }
  0x1c   :  { %s62_s0 = sshll.u32 %s2495_s3, 4  ;;  %s2156_s14 = smov [#allocation3]   ;;  %s63_s0 = int_to_ptr.hbm [resolvable:$true] %s62_s0 }
  0x1d   :  { %s35_s4 = sshll.u32 %s2156_s14, 4  ;;  %s2157_s30 = smov [#allocation8]   ;;  %s36_s4 = int_to_ptr.vmem [resolvable:$true] %s35_s4 }
  0x1e   :  { %s64_s19 = sshll.u32 %s2157_s30, 4  ;;  %s87_s2 = sshll.u32 %s2498_s6, 4  ;;  %s65_s19 = int_to_ptr.vmem [resolvable:$true] %s64_s19  ;;  %s88_s2 = int_to_ptr.hbm [resolvable:$true] %s87_s2 }
  0x1f   :  { %s33_s24 = sshll.u32 %s2515_s23, 4  ;;  %s117_s3 = sshll.u32 %s2502_s10, 4  ;;  %s34_s24 = int_to_ptr.hbm [resolvable:$true] %s33_s24  ;;  %s118_s3 = int_to_ptr.hbm [resolvable:$true] %s117_s3 }
  0x20   :  { %41 = dma.hbm_to_vmem [thread:$0]  %s34_s24, 256, %s36_s4, [#allocation4], %s2154_s8, %s2154_s8, %s2155_s27  }
  0x21   :  { %67 = dma.hbm_to_vmem [thread:$0]  %s63_s0, 16, %s65_s19, [#allocation7]  }
  0x22   :  { %s2158_s23 = smov [#allocation11]   ;;  %s2159_s24 = smov [#allocation14]  }
  0x23   :  { %s89_s28 = sshll.u32 %s2158_s23, 4  ;;  %s119_s29 = sshll.u32 %s2159_s24, 4  ;;  %s90_s28 = int_to_ptr.vmem [resolvable:$true] %s89_s28  ;;  %s120_s29 = int_to_ptr.vmem [resolvable:$true] %s119_s29 }
  0x24   :  { %95 = dma.hbm_to_vmem [thread:$0]  %s88_s2, 1024, %s90_s28, [#allocation10], %s2150_s25, %s2150_s25, %s2151_s26  }
  0x25   :  { %s151_s6 = sshll.u32 %s2508_s16, 4  ;;  %s2160_s10 = smov [#allocation17]   ;;  %s152_s6 = int_to_ptr.hbm [resolvable:$true] %s151_s6 }
  0x26   :  { %125 = dma.hbm_to_vmem [thread:$0]  %s118_s3, 1024, %s120_s29, [#allocation13], %s2150_s25, %s2150_s25, %s2151_s26  }
  0x27   :  { %s153_s0 = sshll.u32 %s2160_s10, 4  ;;  %s154_s0 = int_to_ptr.vmem [resolvable:$true] %s153_s0 }
  0x28   :  { %159 = dma.hbm_to_vmem [thread:$0]  %s152_s6, 2048, %s154_s0, [#allocation16], %s2150_s25, %s2150_s25, %s2151_s26  }
  0x29   :  { %2134 = dma.done.wait [#allocation4], 256  }
  0x2a   :  { %2135 = vsyncadd [#allocation4], 4294967040 }
  0x2b   :  { %2136 = dma.done.wait [#allocation7], 48  }
  0x2c   :  { %2137 = vsyncadd [#allocation7], 4294967248 }
  0x2d   :  { %2138 = dma.done.wait [#allocation10], 2048  }
  0x2e   :  { %2139 = vsyncadd [#allocation10], 4294965248 }
  0x2f   :  { %2140 = dma.done.wait [#allocation13], 2048  }
  0x30   :  { %2141 = vsyncadd [#allocation13], 4294965248 }
  0x31   :  { %2142 = dma.done.wait [#allocation16], 4096  }
  0x32   :  { %2143 = vsyncadd [#allocation16], 4294963200  ;;  %v2308_v0 = vld [vmem:[#allocation3] sm:$0xff]  ;;  %v2313_v2 = vld [vmem:[#allocation3 + $0x8] sm:$0xff]  ;;  %v2161_v4 = vmov 128.0   ;;  %s2516_s30 = sld [smem:[#allocation27_spill]] }
  0x33   :  { %205 = vadd.xlane.f32.xlu0 %v2308_v0  ;;  %v218_v1 = vmul.f32 %v2308_v0, %v2308_v0  ;;  %v219_v3 = vmul.f32 %v2313_v2, %v2313_v2  ;;  %1852 = vrcp.f32 %v2161_v4  ;;  %v1765_v5 = vld [vmem:[#allocation9 + $0x38] sm:$0xff]  ;;  %v1764_v10 = vld [vmem:[#allocation9 + $0x30] sm:$0xff]  ;;  %v1763_v14 = vld [vmem:[#allocation9 + $0x28] sm:$0xff]  ;;  %vm527_vm7 = vcmask 261120   ;;  %s2164_s29 = smov [#allocation18]   ;;  %s1469_s10 = sshll.u32 %s2510_s18, 4  ;;  %s1470_s10 = int_to_ptr.hbm [resolvable:$true] %s1469_s10 }
  0x34   :  { %v1773_v6 = vld [vmem:[#allocation11 + $0x38] sm:$0xff]  ;;  %335 = vmatpush.bf16.msra.mxu0 %v1765_v5  ;;  %v1772_v11 = vld [vmem:[#allocation11 + $0x30] sm:$0xff]  ;;  %v1771_v15 = vld [vmem:[#allocation11 + $0x28] sm:$0xff]  ;;  %vm594_vm8 = vcmask 1043456   ;;  %vm566_vm9 = vcmask 64512   ;;  %vm770_vm10 = vcmask 523520  }
  0x35   :  { %220 = vadd.xlane.f32.xlu1 %v218_v1  ;;  %v1781_v7 = vld [vmem:[#allocation12 + $0x38] sm:$0xff]  ;;  %417 = vmatpush.bf16.msra.mxu1 %v1773_v6  ;;  %v1780_v12 = vld [vmem:[#allocation12 + $0x30] sm:$0xff]  ;;  %v1779_v16 = vld [vmem:[#allocation12 + $0x28] sm:$0xff]  ;;  %vm893_vm11 = vcmask 785920   ;;  %vm1016_vm12 = vcmask 1048320   ;;  %s1467_s14 = sshll.u32 %s2164_s29, 4  ;;  %s1468_s14 = int_to_ptr.vmem [resolvable:$true] %s1467_s14 }
  0x36   :  { %499 = vmatpush.bf16.msra.mxu2 %v1781_v7  ;;  %v1762_v18 = vld [vmem:[#allocation9 + $0x20] sm:$0xff]  ;;  %v1761_v22 = vld [vmem:[#allocation9 + $0x18] sm:$0xff]  ;;  %v1760_v26 = vld [vmem:[#allocation9 + $0x10] sm:$0xff] }
  0x37   :  { %v1770_v19 = vld [vmem:[#allocation11 + $0x20] sm:$0xff]  ;;  %v1769_v23 = vld [vmem:[#allocation11 + $0x18] sm:$0xff]  ;;  %v1768_v27 = vld [vmem:[#allocation11 + $0x10] sm:$0xff] }
  0x38   :  { %336 = vmatpush.bf16.msra.mxu0 %v1764_v10  ;;  %v1778_v20 = vld [vmem:[#allocation12 + $0x20] sm:$0xff]  ;;  %v1777_v24 = vld [vmem:[#allocation12 + $0x18] sm:$0xff]  ;;  %v1776_v28 = vld [vmem:[#allocation12 + $0x10] sm:$0xff] }
  0x39   :  { %v1853_v8 = vpop.eup %1852  ;;  %418 = vmatpush.bf16.msra.mxu1 %v1772_v11  ;;  %v1759_v32 = vld [vmem:[#allocation9 + $0x8] sm:$0xff]  ;;  %v1758_v37 = vld [vmem:[#allocation9] sm:$0xff]  ;;  %v1841_v58 = vld [vmem:[%s2516_s30] ss:$0 sm:$0xff] }
  0x3a   :  { %v210_v9 = vmul.f32 128.0, %v1853_v8  ;;  %500 = vmatpush.bf16.msra.mxu2 %v1780_v12  ;;  %vm214_vm0 = vweird.f32 %v1853_v8  ;;  %v1767_v33 = vld [vmem:[#allocation11 + $0x8] sm:$0xff]  ;;  %v1766_v38 = vld [vmem:[#allocation11] sm:$0xff]  ;;  %v1842_v7 = vld [vmem:[#allocation8] ss:$0 sm:$0xff] }
  0x3b   :  { %207 = vadd.xlane.f32.xlu0 %v2313_v2  ;;  %v1775_v34 = vld [vmem:[#allocation12 + $0x8] sm:$0xff]  ;;  %v1774_v40 = vld [vmem:[#allocation12] sm:$0xff]  ;;  %v1843_v12 = vld [vmem:[%s2497_s5] ss:$0 sm:$0xff]  ;;  %s2162_s5 = smov 96  }
  0x3c   :  { %v211_v13 = vsub.f32 1.0, %v210_v9  ;;  %337 = vmatpush.bf16.msra.mxu0 %v1763_v14 }
  0x3d   :  { %222 = vadd.xlane.f32.xlu1 %v219_v3  ;;  %419 = vmatpush.bf16.msra.mxu1 %v1771_v15 }
  0x3e   :  { %501 = vmatpush.bf16.msra.mxu2 %v1779_v16  ;;  %v212_v17 = vmul.f32 %v1853_v8, %v211_v13  ;;  %v1844_v13 = vld [vmem:[%s2499_s7] ss:$0 sm:$0xff]  ;;  %s2163_s7 = smov 32  }
  0x40   :  { %338 = vmatpush.bf16.msra.mxu0 %v1762_v18  ;;  %v213_v21 = vadd.f32 %v1853_v8, %v212_v17 }
  0x41   :  { %420 = vmatpush.bf16.msra.mxu1 %v1770_v19 }
  0x42   :  { %502 = vmatpush.bf16.msra.mxu2 %v1778_v20  ;;  %v2318_v25 = vsel %vm214_vm0, %v1853_v8, %v213_v21  ;;  %v1845_v20 = vld [vmem:[%s2501_s9] ss:$0 sm:$0xff] }
  0x44   :  { %339 = vmatpush.bf16.msra.mxu0 %v1761_v22 }
  0x45   :  { %421 = vmatpush.bf16.msra.mxu1 %v1769_v23 }
  0x46   :  { %503 = vmatpush.bf16.msra.mxu2 %v1777_v24 }
  0x48   :  { %340 = vmatpush.bf16.msra.mxu0 %v1760_v26 }
  0x49   :  { %422 = vmatpush.bf16.msra.mxu1 %v1768_v27 }
  0x4a   :  { %504 = vmatpush.bf16.msra.mxu2 %v1776_v28 }
  0x4c   :  { %341 = vmatpush.bf16.msra.mxu0 %v1759_v32 }
  0x4d   :  { %423 = vmatpush.bf16.msra.mxu1 %v1767_v33 }
  0x4e   :  { %505 = vmatpush.bf16.msra.mxu2 %v1775_v34 }
  0x50   :  { %342 = vmatpush.bf16.msra.mxu0 %v1758_v37 }
  0x51   :  { %424 = vmatpush.bf16.msra.mxu1 %v1766_v38 }
  0x52   :  { %506 = vmatpush.bf16.msra.mxu2 %v1774_v40 }
  0xa6   :  { %v206_v29 = vpop.xlane.xlu0 %205 }
  0xa7   :  { %v216_v30 = vmul.f32 %v2318_v25, %v206_v29 }
  0xa8   :  { %v221_v31 = vpop.xlane.xlu1 %220 }
  0xa9   :  { %v226_v35 = vmul.f32 %v216_v30, %v216_v30  ;;  %v224_v36 = vmul.f32 %v221_v31, %v2318_v25  ;;  %v230_v1 = vsub.f32 %v2308_v0, %v216_v30 }
  0xab   :  { %v228_v39 = vsub.f32 %v224_v36, %v226_v35 }
  0xad   :  { %v232_v41 = vadd.f32 1e-06, %v228_v39 }
  0xae   :  { %v208_v42 = vpop.xlane.xlu0 %207 }
  0xaf   :  { %1854 = vrsqrt.f32 %v232_v41  ;;  %v217_v43 = vmul.f32 %v2318_v25, %v208_v42  ;;  %vm240_vm2 = vweird.f32 %v232_v41 }
  0xb0   :  { %v223_v44 = vpop.xlane.xlu1 %222 }
  0xb1   :  { %v227_v45 = vmul.f32 %v217_v43, %v217_v43  ;;  %v225_v46 = vmul.f32 %v223_v44, %v2318_v25  ;;  %v231_v4 = vsub.f32 %v2313_v2, %v217_v43 }
  0xb3   :  { %v229_v47 = vsub.f32 %v225_v46, %v227_v45 }
  0xb5   :  { %v1855_v48 = vpop.eup %1854  ;;  %v233_v49 = vadd.f32 1e-06, %v229_v47 }
  0xb6   :  { %v235_v50 = vmul.f32 %v1855_v48, %v232_v41  ;;  %vm241_vm1 = vweird.f32 %v1855_v48 }
  0xb7   :  { %1856 = vrsqrt.f32 %v233_v49  ;;  %vm242_vm3 = vmor %vm240_vm2, %vm241_vm1  ;;  %vm250_vm5 = vweird.f32 %v233_v49 }
  0xb8   :  { %v236_v51 = vmul.f32 %v1855_v48, %v235_v50 }
  0xba   :  { %v237_v52 = vmul.f32 0.5, %v236_v51 }
  0xbc   :  { %v238_v53 = vsub.f32 1.5, %v237_v52 }
  0xbd   :  { %v1857_v54 = vpop.eup %1856 }
  0xbe   :  { %v239_v55 = vmul.f32 %v1855_v48, %v238_v53  ;;  %v245_v56 = vmul.f32 %v1857_v54, %v233_v49  ;;  %vm251_vm4 = vweird.f32 %v1857_v54 }
  0xbf   :  { %vm252_vm6 = vmor %vm250_vm5, %vm251_vm4 }
  0xc0   :  { %v246_v57 = vmul.f32 %v1857_v54, %v245_v56  ;;  %v243_v59 = vsel %vm242_vm3, %v1855_v48, %v239_v55 }
  0xc1   :  { %v257_v62 = vmul.f32 %v1841_v58, %v243_v59 }
  0xc2   :  { %v247_v60 = vmul.f32 0.5, %v246_v57 }
  0xc3   :  { %v259_v6 = vmul.f32 %v257_v62, %v230_v1 }
  0xc4   :  { %v248_v61 = vsub.f32 1.5, %v247_v60 }
  0xc5   :  { %v264_v9 = vadd.f32 %v1842_v7, %v259_v6 }
  0xc6   :  { %v249_v63 = vmul.f32 %v1857_v54, %v248_v61 }
  0xc8   :  { %v253_v3 = vsel %vm252_vm6, %v1857_v54, %v249_v63  ;;  %v1846_v63 = vld [vmem:[#allocation6] ss:$0 sm:$0xff] }
  0xc9   :  { %v258_v5 = vmul.f32 %v1841_v58, %v253_v3 }
  0xcb   :  { %v260_v8 = vmul.f32 %v258_v5, %v231_v4 }
  0xcd   :  { %v265_v10 = vadd.f32 %v1842_v7, %v260_v8  ;;  %v1847_v8 = vld [vmem:[#allocation6 + $0x1] ss:$0 sm:$0xff] }
  0xcf   :  { %v266_v11 = vpack.c.bf16 %v265_v10, %v264_v9 }
  0xd1   :  { %343 = vmatmul.bf16.vlgmr.msra.gmra.mxu0 %v266_v11  ;;  %425 = vmatmul.bf16.vlgmr.msra.gmra.mxu1 %v266_v11 }
  0xd2   :  { %507 = vmatmul.bf16.vlgmr.msra.gmra.mxu2 %v266_v11 }
 0x14e   :  { %v344_v14 = vpop.f32.mrf.mxu0  ;;  %v426_v15 = vpop.f32.mrf.mxu1 }
 0x14f   :  { %v345_v16 = vadd.f32 %v1843_v12, %v344_v14  ;;  %v427_v17 = vadd.f32 %v1844_v13, %v426_v15 }
 0x151   :  { %v513_v18 = vmul.f32 0.17677669, %v345_v16  ;;  %v517_v19 = vpack.c.bf16 %v427_v17, %v427_v17 }
 0x153   :  { %v638_v21 = vunpack.c.l.b16 %v517_v19  ;;  %v532_v22 = vsel %vm527_vm7, %v517_v19, 0  ;;  %v515_v23 = vpack.c.bf16 %v513_v18, %v513_v18 }
 0x154   :  { %541 = vmatpush.bf16.xpose.msra.mxu3 %v532_v22 }
 0x155   :  { %v639_v24 = vpack.c.b16 %v638_v21, %v638_v21  ;;  %v508_v26 = vpop.f32.mrf.mxu2  ;;  %v633_v33 = vunpack.c.l.b16 %v515_v23 }
 0x156   :  { %v509_v27 = vadd.f32 %v1845_v20, %v508_v26  ;;  %v346_v28 = vpop.f32.mrf.mxu0  ;;  %v428_v29 = vpop.f32.mrf.mxu1 }
 0x157   :  { %v347_v30 = vadd.f32 %v1843_v12, %v346_v28  ;;  %v429_v31 = vadd.f32 %v1844_v13, %v428_v29  ;;  %640 = vrot.lane.b32.xlu2 %v639_v24, %s2162_s5  ;;  %v634_v43 = vpack.c.b16 %v633_v33, %v633_v33 }
 0x158   :  { %v2340_v32 = vpack.c.bf16 %v509_v27, %v509_v27 }
 0x159   :  { %v514_v34 = vmul.f32 0.17677669, %v347_v30  ;;  %v518_v35 = vpack.c.bf16 %v429_v31, %v429_v31 }
 0x15a   :  { %v596_v39 = vsel %vm594_vm8, %v2340_v32, 0  ;;  %v715_v21 = vunpack.c.l.b16 %v2340_v32 }
 0x15b   :  { %v516_v36 = vpack.c.bf16 %v514_v34, %v514_v34  ;;  %v667_v37 = vunpack.c.l.b16 %v518_v35  ;;  %1582 = vmatmul.msk.bf16.vlgmr.msra.gmra.mxu3 %vm527_vm7, %v515_v23  ;;  %v551_v38 = vsel %vm527_vm7, %v518_v35, 0 }
 0x15c   :  { %560 = vmatpush.bf16.xpose.msrb.mxu3 %v551_v38 }
 0x15d   :  { %v662_v40 = vunpack.c.l.b16 %v516_v36  ;;  %v668_v41 = vpack.c.b16 %v667_v37, %v667_v37  ;;  %v510_v42 = vpop.f32.mrf.mxu2 }
 0x15e   :  { %v511_v44 = vadd.f32 %v1845_v20, %v510_v42 }
 0x15f   :  { %669 = vrot.lane.b32.xlu0 %v668_v41, %s2162_s5  ;;  %635 = vrot.lane.b32.xlu2 %v634_v43, %s2162_s5  ;;  %v663_v45 = vpack.c.b16 %v662_v40, %v662_v40 }
 0x160   :  { %v2348_v46 = vpack.c.bf16 %v511_v44, %v511_v44 }
 0x161   :  { %664 = vrot.lane.b32.xlu1 %v663_v45, %s2162_s5 }
 0x162   :  { %v615_v47 = vsel %vm594_vm8, %v2348_v46, 0 }
 0x163   :  { %624 = vmatpush.bf16.msrb.mxu0 %v615_v47 }
 0x164   :  { %605 = vmatpush.bf16.msra.mxu3 %v596_v39 }
 0x167   :  { %796 = vrot.lane.b32.xlu0 %v663_v45, %s2150_s25  ;;  %775 = vrot.lane.b32.xlu2 %v639_v24, %s2150_s25 }
 0x169   :  { %921 = vrot.lane.b32.xlu1 %v668_v41, %s2163_s7 }
 0x16b   :  { %1583 = vmatmul.msk.bf16.vlgmr.msrb.gmra.mxu3 %vm527_vm7, %v516_v36 }
 0x16f   :  { %896 = vrot.lane.b32.xlu0 %v634_v43, %s2163_s7  ;;  %798 = vrot.lane.b32.xlu2 %v668_v41, %s2150_s25 }
 0x177   :  { %773 = vrot.lane.b32.xlu2 %v634_v43, %s2150_s25  ;;  %v739_v43 = vunpack.c.l.b16 %v2348_v46 }
 0x17f   :  { %898 = vrot.lane.b32.xlu2 %v639_v24, %s2163_s7  ;;  %v2379_v24 = vpack.c.b16 %v715_v21, %v715_v21 }
 0x187   :  { %919 = vrot.lane.b32.xlu2 %v663_v45, %s2163_s7  ;;  %v2388_v45 = vpack.c.b16 %v739_v43, %v739_v43 }
 0x1b1   :  { %v641_v48 = vpop.permute.xlu2 %640 }
 0x1b2   :  { %v646_v49 = vsel %vm527_vm7, %v641_v48, 0 }
 0x1b3   :  { %655 = vmatpush.bf16.xpose.msrb.mxu2 %v646_v49 }
 0x1b9   :  { %v636_v50 = vpop.permute.xlu2 %635 }
 0x1ba   :  { %1586 = vmatmul.msk.bf16.vlgmr.msrb.gmra.mxu2 %vm527_vm7, %v636_v50 }
 0x1c1   :  { %v776_v51 = vpop.permute.xlu2 %775 }
 0x1c2   :  { %v781_v52 = vsel %vm527_vm7, %v776_v51, 0 }
 0x1c3   :  { %790 = vmatpush.bf16.xpose.msrb.mxu1 %v781_v52 }
 0x1c9   :  { %v799_v53 = vpop.permute.xlu2 %798 }
 0x1ca   :  { %v804_v57 = vsel %vm527_vm7, %v799_v53, 0 }
 0x1d1   :  { %v670_v54 = vpop.permute.xlu0 %669  ;;  %v774_v55 = vpop.permute.xlu2 %773 }
 0x1d2   :  { %v675_v56 = vsel %vm527_vm7, %v670_v54, 0  ;;  %1590 = vmatmul.msk.bf16.vlgmr.msrb.gmra.mxu1 %vm527_vm7, %v774_v55 }
 0x1d3   :  { %684 = vmatpush.bf16.xpose.msra.mxu2 %v675_v56  ;;  %v665_v58 = vpop.permute.xlu1 %664 }
 0x1d9   :  { %v797_v59 = vpop.permute.xlu0 %796  ;;  %v899_v60 = vpop.permute.xlu2 %898 }
 0x1da   :  { %v904_v61 = vsel %vm527_vm7, %v899_v60, 0  ;;  %1587 = vmatmul.msk.bf16.vlgmr.msra.gmra.mxu2 %vm527_vm7, %v665_v58 }
 0x1db   :  { %813 = vmatpush.bf16.xpose.msrb.mxu2 %v804_v57  ;;  %v922_v62 = vpop.permute.xlu1 %921  ;;  %913 = vmatpush.bf16.xpose.msra.mxu1 %v904_v61 }
 0x1dc   :  { %v927_v1 = vsel %vm527_vm7, %v922_v62, 0 }
 0x1de   :  { %v543_v3 = vpop.f32.mrf.mxu3 }
 0x1df   :  { %v544_v4 = vadd.f32 %v1846_v63, %v543_v3 }
 0x1e1   :  { %v897_v5 = vpop.permute.xlu0 %896  ;;  %v567_v6 = vsel %vm566_vm9, %v544_v4, -inf  ;;  %v920_v13 = vpop.permute.xlu2 %919 }
 0x1e2   :  { %1594 = vmatmul.msk.bf16.vlgmr.msra.gmra.mxu1 %vm527_vm7, %v897_v5  ;;  %568 = vmax.xlane.f32.xlu1 %v567_v6 }
 0x1e3   :  { %936 = vmatpush.bf16.xpose.msra.mxu2 %v927_v1 }
 0x1e6   :  { %v545_v7 = vpop.f32.mrf.mxu3 }
 0x1ea   :  { %1591 = vmatmul.msk.bf16.vlgmr.msrb.gmra.mxu2 %vm527_vm7, %v797_v59 }
 0x1ee   :  { %v562_v9 = vpop.f32.mrf.mxu3 }
 0x1ef   :  { %v563_v10 = vadd.f32 %v1847_v8, %v562_v9 }
 0x1f1   :  { %v570_v11 = vsel %vm566_vm9, %v563_v10, -inf }
 0x1f2   :  { %571 = vmax.xlane.f32.xlu0 %v570_v11 }
 0x1f6   :  { %v564_v12 = vpop.f32.mrf.mxu3 }
 0x1fa   :  { %1595 = vmatmul.msk.bf16.vlgmr.msra.gmra.mxu2 %vm527_vm7, %v920_v13 }
 0x23d   :  { %v657_v14 = vpop.f32.mrf.mxu2 }
 0x23e   :  { %v658_v15 = vadd.f32 %v1846_v63, %v657_v14 }
 0x240   :  { %v690_v16 = vsel %vm566_vm9, %v658_v15, -inf }
 0x241   :  { %691 = vmax.xlane.f32.xlu2 %v690_v16 }
 0x245   :  { %v659_v17 = vpop.f32.mrf.mxu2 }
 0x24f   :  { %v792_v18 = vpop.f32.mrf.mxu1 }
 0x250   :  { %v793_v19 = vadd.f32 %v1846_v63, %v792_v18 }
 0x252   :  { %v819_v20 = vsel %vm566_vm9, %v793_v19, -inf }
 0x253   :  { %820 = vmax.xlane.f32.xlu0 %v819_v20 }
 0x255   :  { %v569_v22 = vpop.xlane.xlu1 %568 }
 0x256   :  { %v573_v23 = vsub.f32 %v544_v4, %v569_v22 }
 0x257   :  { %v794_v26 = vpop.f32.mrf.mxu1 }
 0x258   :  { %v575_v27 = vmul.f32 1.442695, %v573_v23 }
 0x259   :  { %843 = vrot.lane.b32.xlu2 %v2379_v24, %s2150_s25 }
 0x25a   :  { %1858 = vpow2.f32 %v575_v27 }
 0x25d   :  { %v686_v28 = vpop.f32.mrf.mxu2 }
 0x25e   :  { %v687_v29 = vadd.f32 %v1847_v8, %v686_v28 }
 0x25f   :  { %v915_v30 = vpop.f32.mrf.mxu1 }
 0x260   :  { %v1859_v31 = vpop.eup %1858  ;;  %v693_v33 = vsel %vm566_vm9, %v687_v29, -inf  ;;  %v916_v34 = vadd.f32 %v1846_v63, %v915_v30 }
 0x261   :  { %694 = vmax.xlane.f32.xlu1 %v693_v33  ;;  %v579_v32 = vsel %vm566_vm9, %v1859_v31, 0.0 }
 0x262   :  { %580 = vadd.xlane.f32.xlu0 %v579_v32  ;;  %v942_v40 = vsel %vm566_vm9, %v916_v34, -inf }
 0x265   :  { %v688_v35 = vpop.f32.mrf.mxu2  ;;  %v572_v36 = vpop.xlane.xlu0 %571 }
 0x266   :  { %v574_v37 = vsub.f32 %v563_v10, %v572_v36 }
 0x267   :  { %v917_v38 = vpop.f32.mrf.mxu1 }
 0x268   :  { %v577_v39 = vmul.f32 1.442695, %v574_v37 }
 0x269   :  { %943 = vmax.xlane.f32.xlu1 %v942_v40 }
 0x26a   :  { %1860 = vpow2.f32 %v577_v39 }
 0x26d   :  { %v815_v41 = vpop.f32.mrf.mxu2 }
 0x26e   :  { %v816_v48 = vadd.f32 %v1847_v8, %v815_v41 }
 0x270   :  { %v1861_v42 = vpop.eup %1860  ;;  %v822_v50 = vsel %vm566_vm9, %v816_v48, -inf }
 0x271   :  { %v582_v44 = vsel %vm566_vm9, %v1861_v42, 0.0 }
 0x272   :  { %583 = vadd.xlane.f32.xlu1 %v582_v44 }
 0x275   :  { %v817_v47 = vpop.f32.mrf.mxu2 }
 0x276   :  { %741 = vrot.lane.b32.xlu0 %v2388_v45, %s2162_s5 }
 0x27d   :  { %v938_v49 = vpop.f32.mrf.mxu2 }
 0x27e   :  { %v939_v51 = vadd.f32 %v1847_v8, %v938_v49 }
 0x280   :  { %v945_v53 = vsel %vm566_vm9, %v939_v51, -inf }
 0x282   :  { %823 = vmax.xlane.f32.xlu2 %v822_v50 }
 0x285   :  { %v940_v52 = vpop.f32.mrf.mxu2 }
 0x28a   :  { %946 = vmax.xlane.f32.xlu2 %v945_v53 }
 0x28b   :  { %717 = vrot.lane.b32.xlu1 %v2379_v24, %s2162_s5 }
 0x2b4   :  { %v692_v46 = vpop.xlane.xlu2 %691 }
 0x2b5   :  { %v696_v54 = vsub.f32 %v658_v15, %v692_v46 }
 0x2b7   :  { %v698_v55 = vmul.f32 1.442695, %v696_v54 }
 0x2b9   :  { %1862 = vpow2.f32 %v698_v55 }
 0x2bf   :  { %v2396_v56 = vpop.eup %1862 }
 0x2c0   :  { %v702_v57 = vsel %vm566_vm9, %v2396_v56, 0.0 }
 0x2c1   :  { %703 = vadd.xlane.f32.xlu0 %v702_v57 }
 0x2c6   :  { %v821_v58 = vpop.xlane.xlu0 %820 }
 0x2c7   :  { %v825_v59 = vsub.f32 %v793_v19, %v821_v58  ;;  %v844_v19 = vpop.permute.xlu2 %843 }
 0x2c9   :  { %v827_v60 = vmul.f32 1.442695, %v825_v59 }
 0x2cb   :  { %1864 = vpow2.f32 %v827_v60 }
 0x2d1   :  { %v2400_v61 = vpop.eup %1864 }
 0x2d2   :  { %v831_v62 = vsel %vm566_vm9, %v2400_v61, 0.0 }
 0x2d3   :  { %832 = vadd.xlane.f32.xlu2 %v831_v62 }
 0x2d4   :  { %v695_v63 = vpop.xlane.xlu1 %694 }
 0x2d5   :  { %v697_v1 = vsub.f32 %v687_v29, %v695_v63  ;;  %864 = vrot.lane.b32.xlu0 %v2388_v45, %s2150_s25  ;;  %v581_v3 = vpop.xlane.xlu0 %580 }
 0x2d6   :  { %1866 = vrcp.f32 %v581_v3 }
 0x2d7   :  { %v700_v4 = vmul.f32 1.442695, %v697_v1 }
 0x2d9   :  { %1868 = vpow2.f32 %v700_v4 }
 0x2dc   :  { %v1867_v5 = vpop.eup %1866  ;;  %v944_v6 = vpop.xlane.xlu1 %943 }
 0x2dd   :  { %v587_v7 = vmul.f32 %v1867_v5, %v1859_v31  ;;  %v948_v8 = vsub.f32 %v916_v34, %v944_v6  ;;  %v849_v31 = vsel %vm594_vm8, %v844_v19, 0 }
 0x2df   :  { %v1869_v9 = vpop.eup %1868  ;;  %v589_v10 = vpack.c.bf16 %v587_v7, %v587_v7  ;;  %v950_v11 = vmul.f32 1.442695, %v948_v8 }
 0x2e0   :  { %v705_v12 = vsel %vm566_vm9, %v1869_v9, 0.0 }
 0x2e1   :  { %1870 = vpow2.f32 %v950_v11  ;;  %1584 = vmatmul.msk.bf16.vlgmr.msra.gmra.mxu3 %vm566_vm9, %v589_v10  ;;  %706 = vadd.xlane.f32.xlu2 %v705_v12 }
 0x2e5   :  { %v584_v13 = vpop.xlane.xlu1 %583 }
 0x2e6   :  { %1872 = vrcp.f32 %v584_v13 }
 0x2e7   :  { %v2408_v14 = vpop.eup %1870 }
 0x2e8   :  { %v742_v15 = vpop.permute.xlu0 %741  ;;  %v954_v16 = vsel %vm566_vm9, %v2408_v14, 0.0 }
 0x2e9   :  { %v747_v17 = vsel %vm594_vm8, %v742_v15, 0  ;;  %955 = vadd.xlane.f32.xlu1 %v954_v16 }
 0x2ea   :  { %756 = vmatpush.bf16.msra.mxu0 %v747_v17 }
 0x2ec   :  { %v1873_v18 = vpop.eup %1872 }
 0x2ed   :  { %v588_v20 = vmul.f32 %v1873_v18, %v1861_v42 }
 0x2ef   :  { %v590_v21 = vpack.c.bf16 %v588_v20, %v588_v20 }
 0x2f1   :  { %1585 = vmatmul.msk.bf16.vlgmr.msrb.gmra.mxu0 %vm566_vm9, %v590_v21 }
 0x2f5   :  { %v824_v22 = vpop.xlane.xlu2 %823 }
 0x2f6   :  { %v826_v23 = vsub.f32 %v816_v48, %v824_v22  ;;  %v1789_v22 = vld [vmem:[#allocation14 + $0x38] sm:$0xff] }
 0x2f7   :  { %1090 = vmatpush.bf16.msrb.mxu1 %v1789_v22  ;;  %v1640_v22 = vld [vmem:[#allocation15 + $0x10] sm:$0xf] }
 0x2f8   :  { %v829_v26 = vmul.f32 1.442695, %v826_v23  ;;  %v1788_v23 = vld [vmem:[#allocation14 + $0x30] sm:$0xff] }
 0x2fa   :  { %1874 = vpow2.f32 %v829_v26  ;;  %v1787_v26 = vld [vmem:[#allocation14 + $0x28] sm:$0xff] }
 0x2fb   :  { %1091 = vmatpush.bf16.msrb.mxu1 %v1788_v23  ;;  %v1793_v23 = vld [vmem:[#allocation15 + $0x14] sm:$0xf0] }
 0x2fd   :  { %v947_v27 = vpop.xlane.xlu2 %946  ;;  %v718_v28 = vpop.permute.xlu1 %717 }
 0x2fe   :  { %v949_v29 = vsub.f32 %v939_v51, %v947_v27  ;;  %v723_v30 = vsel %vm594_vm8, %v718_v28, 0  ;;  %v1786_v27 = vld [vmem:[#allocation14 + $0x20] sm:$0xff]  ;;  %v1785_v28 = vld [vmem:[#allocation14 + $0x18] sm:$0xff] }
 0x2ff   :  { %732 = vmatpush.bf16.msrb.mxu3 %v723_v30  ;;  %1092 = vmatpush.bf16.msrb.mxu1 %v1787_v26  ;;  %v1784_v30 = vld [vmem:[#allocation14 + $0x10] sm:$0xff] }
 0x300   :  { %v1875_v33 = vpop.eup %1874  ;;  %v952_v32 = vmul.f32 1.442695, %v949_v29  ;;  %v1792_v26 = vld [vmem:[#allocation15 + $0x14] sm:$0xf] }
 0x301   :  { %v834_v34 = vsel %vm566_vm9, %v1875_v33, 0.0 }
 0x302   :  { %1876 = vpow2.f32 %v952_v32  ;;  %835 = vadd.xlane.f32.xlu2 %v834_v34 }
 0x303   :  { %858 = vmatpush.bf16.msra.mxu3 %v849_v31  ;;  %1093 = vmatpush.bf16.msrb.mxu1 %v1786_v27  ;;  %v1783_v31 = vld [vmem:[#allocation14 + $0x8] sm:$0xff] }
 0x307   :  { %1094 = vmatpush.bf16.msrb.mxu1 %v1785_v28 }
 0x308   :  { %v1877_v35 = vpop.eup %1876 }
 0x309   :  { %v957_v36 = vsel %vm566_vm9, %v1877_v35, 0.0 }
 0x30a   :  { %958 = vadd.xlane.f32.xlu0 %v957_v36 }
 0x30b   :  { %1095 = vmatpush.bf16.msrb.mxu1 %v1784_v30  ;;  %v1642_v30 = vld [vmem:[#allocation15 + $0x18] sm:$0xf0] }
 0x30f   :  { %1096 = vmatpush.bf16.msrb.mxu1 %v1783_v31  ;;  %v1632_v31 = vld [vmem:[#allocation15] sm:$0xf] }
 0x31a   :  { %966 = vrot.lane.b32.xlu2 %v2379_v24, %s2163_s7 }
 0x322   :  { %987 = vrot.lane.b32.xlu2 %v2388_v45, %s2163_s7 }
 0x334   :  { %v704_v37 = vpop.xlane.xlu0 %703 }
 0x335   :  { %1878 = vrcp.f32 %v704_v37 }
 0x33b   :  { %v1879_v38 = vpop.eup %1878 }
 0x33c   :  { %v710_v39 = vmul.f32 %v1879_v38, %v2396_v56 }
 0x33e   :  { %v712_v40 = vpack.c.bf16 %v710_v39, %v710_v39  ;;  %v1848_v39 = vld [vmem:[%s2503_s11] ss:$0 sm:$0xff] }
 0x340   :  { %1588 = vmatmul.msk.bf16.vlgmr.msrb.gmra.mxu3 %vm566_vm9, %v712_v40 }
 0x346   :  { %v833_v41 = vpop.xlane.xlu2 %832 }
 0x347   :  { %1880 = vrcp.f32 %v833_v41  ;;  %v865_v42 = vpop.permute.xlu0 %864 }
 0x348   :  { %v870_v43 = vsel %vm594_vm8, %v865_v42, 0 }
 0x349   :  { %879 = vmatpush.bf16.msrb.mxu0 %v870_v43 }
 0x34d   :  { %v1881_v44 = vpop.eup %1880 }
 0x34e   :  { %v839_v24 = vmul.f32 %v1881_v44, %v2400_v61 }
 0x350   :  { %v841_v47 = vpack.c.bf16 %v839_v24, %v839_v24 }
 0x352   :  { %1592 = vmatmul.msk.bf16.vlgmr.msra.gmra.mxu3 %vm566_vm9, %v841_v47 }
 0x354   :  { %v707_v45 = vpop.xlane.xlu2 %706 }
 0x355   :  { %1882 = vrcp.f32 %v707_v45 }
 0x35b   :  { %v1883_v48 = vpop.eup %1882 }
 0x35c   :  { %v711_v49 = vmul.f32 %v1883_v48, %v1869_v9  ;;  %v956_v46 = vpop.xlane.xlu1 %955  ;;  %v1688_v48 = vld [vmem:[#allocation15 + $0x70] sm:$0xf] }
 0x35d   :  { %1884 = vrcp.f32 %v956_v46  ;;  %v1803_v46 = vld [vmem:[#allocation15 + $0x64] sm:$0xf0] }
 0x35e   :  { %v713_v50 = vpack.c.bf16 %v711_v49, %v711_v49  ;;  %v1804_v49 = vld [vmem:[#allocation15 + $0x74] sm:$0xf] }
 0x360   :  { %1589 = vmatmul.msk.bf16.vlgmr.msra.gmra.mxu0 %vm566_vm9, %v713_v50 }
 0x363   :  { %v1885_v56 = vpop.eup %1884 }
 0x364   :  { %v607_v51 = vpop.f32.mrf.mxu3  ;;  %v962_v58 = vmul.f32 %v1885_v56, %v2408_v14 }
 0x365   :  { %630 = vst.msk [vmem:[#allocation2] sm:$0xff] %vm527_vm7, %v607_v51  ;;  %v1690_v51 = vld [vmem:[#allocation15 + $0x78] sm:$0xf0] }
 0x366   :  { %v964_v1 = vpack.c.bf16 %v962_v58, %v962_v58  ;;  %v1801_v58 = vld [vmem:[#allocation15 + $0x54] sm:$0xf0] }
 0x36c   :  { %v609_v52 = vpop.f32.mrf.mxu3 }
 0x36d   :  { %v1693_v52 = vor.u32 %v1804_v49, %v1690_v51  ;;  %v1812_v49 = vld [vmem:[#allocation17 + $0x30] sm:$0xff] }
 0x36e   :  { %v626_v53 = vpop.f32.mrf.mxu0 }
 0x36f   :  { %631 = vst.msk [vmem:[#allocation2 + $0x8] sm:$0xff] %vm527_vm7, %v626_v53  ;;  %v1680_v53 = vld [vmem:[#allocation15 + $0x60] sm:$0xf] }
 0x375   :  { %v836_v54 = vpop.xlane.xlu2 %835 }
 0x376   :  { %1886 = vrcp.f32 %v836_v54  ;;  %v628_v55 = vpop.f32.mrf.mxu0  ;;  %v1802_v54 = vld [vmem:[#allocation15 + $0x64] sm:$0xf] }
 0x377   :  { %v1681_v55 = vor.u32 %v1803_v46, %v1680_v53  ;;  %v1811_v46 = vld [vmem:[#allocation17 + $0x28] sm:$0xff] }
 0x37c   :  { %v1887_v57 = vpop.eup %1886 }
 0x37d   :  { %v840_v59 = vmul.f32 %v1887_v57, %v1875_v33  ;;  %v967_v60 = vpop.permute.xlu2 %966  ;;  %v959_v63 = vpop.xlane.xlu0 %958  ;;  %v1782_v33 = vld [vmem:[#allocation14] sm:$0xff]  ;;  %v1672_v57 = vld [vmem:[#allocation15 + $0x50] sm:$0xf] }
 0x37e   :  { %v972_v61 = vsel %vm594_vm8, %v967_v60, 0  ;;  %1888 = vrcp.f32 %v959_v63  ;;  %1097 = vmatpush.bf16.msrb.mxu1 %v1782_v33  ;;  %v1673_v60 = vor.u32 %v1801_v58, %v1672_v57  ;;  %v1664_v63 = vld [vmem:[#allocation15 + $0x40] sm:$0xf]  ;;  %v1791_v33 = vld [vmem:[#allocation15 + $0x4] sm:$0xf0] }
 0x37f   :  { %v842_v62 = vpack.c.bf16 %v840_v59, %v840_v59  ;;  %981 = vmatpush.bf16.msrb.mxu3 %v972_v61  ;;  %v1800_v59 = vld [vmem:[#allocation15 + $0x54] sm:$0xf]  ;;  %v1674_v61 = vld [vmem:[#allocation15 + $0x58] sm:$0xf0] }
 0x381   :  { %1593 = vmatmul.msk.bf16.vlgmr.msrb.gmra.mxu0 %vm566_vm9, %v842_v62  ;;  %v1677_v62 = vor.u32 %v1800_v59, %v1674_v61 }
 0x382   :  { %1596 = vmatmul.msk.bf16.vlgmr.msrb.gmra.mxu3 %vm566_vm9, %v964_v1  ;;  %v1799_v1 = vld [vmem:[#allocation15 + $0x44] sm:$0xf0] }
 0x383   :  { %1279 = vmatpush.bf16.msra.mxu3 %v1693_v52 }
 0x384   :  { %v1889_v5 = vpop.eup %1888 }
 0x385   :  { %v988_v3 = vpop.permute.xlu2 %987  ;;  %v963_v6 = vmul.f32 %v1889_v5, %v1877_v35  ;;  %v1666_v5 = vld [vmem:[#allocation15 + $0x48] sm:$0xf0] }
 0x386   :  { %v993_v4 = vsel %vm594_vm8, %v988_v3, 0  ;;  %v1798_v3 = vld [vmem:[#allocation15 + $0x44] sm:$0xf] }
 0x387   :  { %1002 = vmatpush.bf16.msra.mxu0 %v993_v4  ;;  %v965_v7 = vpack.c.bf16 %v963_v6, %v963_v6  ;;  %v1665_v4 = vor.u32 %v1799_v1, %v1664_v63  ;;  %v1669_v6 = vor.u32 %v1798_v3, %v1666_v5 }
 0x391   :  { %1597 = vmatmul.msk.bf16.vlgmr.msra.gmra.mxu0 %vm566_vm9, %v965_v7  ;;  %v1656_v7 = vld [vmem:[#allocation15 + $0x30] sm:$0xf] }
 0x3c3   :  { %v734_v8 = vpop.f32.mrf.mxu3 }
 0x3c4   :  { %764 = vrot.lane.b32.xlu2 %v734_v8, %s2163_s7  ;;  %v1797_v8 = vld [vmem:[#allocation15 + $0x34] sm:$0xf0] }
 0x3cb   :  { %v736_v9 = vpop.f32.mrf.mxu3 }
 0x3cc   :  { %v1796_v9 = vld [vmem:[#allocation15 + $0x34] sm:$0xf] }
 0x3d5   :  { %v860_v10 = vpop.f32.mrf.mxu3 }
 0x3d6   :  { %887 = vrot.lane.b32.xlu2 %v860_v10, %s2150_s25  ;;  %v1657_v10 = vor.u32 %v1797_v8, %v1656_v7 }
 0x3dd   :  { %v758_v11 = vpop.f32.mrf.mxu0  ;;  %v862_v12 = vpop.f32.mrf.mxu3 }
 0x3de   :  { %766 = vrot.lane.b32.xlu1 %v758_v11, %s2163_s7  ;;  %v1658_v11 = vld [vmem:[#allocation15 + $0x38] sm:$0xf0] }
 0x3df   :  { %v1661_v12 = vor.u32 %v1796_v9, %v1658_v11  ;;  %v1850_v11 = vld [vmem:[%s2505_s13] ss:$0 sm:$0xff] }
 0x3e5   :  { %v760_v13 = vpop.f32.mrf.mxu0 }
 0x3e6   :  { %v1648_v13 = vld [vmem:[#allocation15 + $0x20] sm:$0xf] }
 0x3fe   :  { %v881_v14 = vpop.f32.mrf.mxu0 }
 0x3ff   :  { %889 = vrot.lane.b32.xlu0 %v881_v14, %s2150_s25  ;;  %v1795_v14 = vld [vmem:[#allocation15 + $0x24] sm:$0xf0] }
 0x405   :  { %v983_v15 = vpop.f32.mrf.mxu3 }
 0x406   :  { %v883_v16 = vpop.f32.mrf.mxu0  ;;  %1010 = vrot.lane.b32.xlu2 %v983_v15, %s2162_s5  ;;  %v1794_v15 = vld [vmem:[#allocation15 + $0x24] sm:$0xf] }
 0x407   :  { %v1649_v16 = vor.u32 %v1795_v14, %v1648_v13 }
 0x40d   :  { %v985_v17 = vpop.f32.mrf.mxu3 }
 0x40e   :  { %v1004_v18 = vpop.f32.mrf.mxu0  ;;  %v1650_v17 = vld [vmem:[#allocation15 + $0x28] sm:$0xf0] }
 0x40f   :  { %1012 = vrot.lane.b32.xlu2 %v1004_v18, %s2162_s5 }
 0x416   :  { %v1006_v19 = vpop.f32.mrf.mxu0 }
 0x417   :  { %v1653_v19 = vor.u32 %v1794_v15, %v1650_v17  ;;  %v1817_v17 = vld [vmem:[#allocation17 + $0x58] sm:$0xff] }
 0x41e   :  { %v765_v20 = vpop.permute.xlu2 %764 }
 0x41f   :  { %771 = vst.msk [vmem:[#allocation2] sm:$0xff] %vm770_vm10, %v765_v20 }
 0x430   :  { %v888_v21 = vpop.permute.xlu2 %887 }
 0x431   :  { %894 = vst.msk [vmem:[#allocation2] sm:$0xff] %vm893_vm11, %v888_v21 }
 0x450   :  { %v767_v29 = vpop.permute.xlu1 %766 }
 0x451   :  { %772 = vst.msk [vmem:[#allocation2 + $0x8] sm:$0xff] %vm770_vm10, %v767_v29  ;;  %v1641_v29 = vor.u32 %v1793_v23, %v1640_v22  ;;  %v1806_v22 = vld [vmem:[#allocation17] sm:$0xff] }
 0x452   :  { %v1814_v23 = vld [vmem:[#allocation17 + $0x40] sm:$0xff] }
 0x460   :  { %v1011_v32 = vpop.permute.xlu2 %1010 }
 0x461   :  { %1017 = vst.msk [vmem:[#allocation2] sm:$0xff] %vm1016_vm12, %v1011_v32  ;;  %v1645_v32 = vor.u32 %v1792_v26, %v1642_v30  ;;  %v1179_v26 = vld [vmem:[%s2507_s15] sm:$0x3] }
 0x462   :  { %v1182_v30 = vperm.slane %v1179_v26, 1 }
 0x468   :  { %v1019_v36 = vld [vmem:[#allocation2] sm:$0xff] }
 0x469   :  { %v1013_v35 = vpop.permute.xlu2 %1012 }
 0x471   :  { %v890_v34 = vpop.permute.xlu0 %889 }
 0x472   :  { %895 = vst.msk [vmem:[#allocation2 + $0x8] sm:$0xff] %vm893_vm11, %v890_v34  ;;  %v1790_v34 = vld [vmem:[#allocation15 + $0x4] sm:$0xf] }
 0x473   :  { %1018 = vst.msk [vmem:[#allocation2 + $0x8] sm:$0xff] %vm1016_vm12, %v1013_v35  ;;  %v1634_v35 = vld [vmem:[#allocation15 + $0x8] sm:$0xf0] }
 0x47a   :  { %v1020_v37 = vld [vmem:[#allocation2 + $0x8] sm:$0xff] }
 0x47b   :  { %v1021_v38 = vpack.c.bf16 %v1020_v37, %v1019_v36  ;;  %v1633_v37 = vor.u32 %v1791_v33, %v1632_v31 }
 0x47d   :  { %1098 = vmatmul.bf16.vlgmr.msrb.gmra.mxu1 %v1021_v38  ;;  %v1637_v38 = vor.u32 %v1790_v34, %v1634_v35 }
 0x4fa   :  { %v1099_v40 = vpop.f32.mrf.mxu1 }
 0x4fb   :  { %v1100_v41 = vadd.f32 %v1848_v39, %v1099_v40 }
 0x4fd   :  { %v2450_v42 = vadd.f32 %v1100_v41, %v2308_v0  ;;  %v1805_v0 = vld [vmem:[#allocation15 + $0x74] sm:$0xf0] }
 0x4fe   :  { %v1689_v50 = vor.u32 %v1805_v0, %v1688_v48  ;;  %v1821_v48 = vld [vmem:[#allocation17 + $0x78] sm:$0xff] }
 0x4ff   :  { %1108 = vadd.xlane.f32.xlu1 %v2450_v42  ;;  %v1114_v43 = vmul.f32 %v2450_v42, %v2450_v42  ;;  %1445 = vmatpush.bf16.msra.mxu1 %v1821_v48 }
 0x500   :  { %1265 = vmatpush.bf16.msrb.mxu2 %v1689_v50  ;;  %v1820_v50 = vld [vmem:[#allocation17 + $0x70] sm:$0xff] }
 0x501   :  { %1116 = vadd.xlane.f32.xlu2 %v1114_v43 }
 0x502   :  { %v1101_v44 = vpop.f32.mrf.mxu1 }
 0x503   :  { %v1102_v24 = vadd.f32 %v1848_v39, %v1101_v44  ;;  %1446 = vmatpush.bf16.msra.mxu1 %v1820_v50 }
 0x504   :  { %1266 = vmatpush.bf16.msrb.mxu2 %v1681_v55 }
 0x505   :  { %v2456_v47 = vadd.f32 %v1102_v24, %v2313_v2  ;;  %v1682_v2 = vld [vmem:[#allocation15 + $0x68] sm:$0xf0] }
 0x506   :  { %v1685_v56 = vor.u32 %v1802_v54, %v1682_v2  ;;  %v1819_v54 = vld [vmem:[#allocation17 + $0x68] sm:$0xff] }
 0x507   :  { %1110 = vadd.xlane.f32.xlu0 %v2456_v47  ;;  %v1115_v45 = vmul.f32 %v2456_v47, %v2456_v47  ;;  %1447 = vmatpush.bf16.msra.mxu1 %v1819_v54 }
 0x508   :  { %1280 = vmatpush.bf16.msra.mxu3 %v1685_v56  ;;  %1267 = vmatpush.bf16.msrb.mxu2 %v1673_v60  ;;  %v1818_v56 = vld [vmem:[#allocation17 + $0x60] sm:$0xff] }
 0x509   :  { %1118 = vadd.xlane.f32.xlu1 %v1115_v45  ;;  %v1813_v45 = vld [vmem:[#allocation17 + $0x38] sm:$0xff] }
 0x50a   :  { %1431 = vmatpush.bf16.msrb.mxu0 %v1813_v45 }
 0x50b   :  { %1448 = vmatpush.bf16.msra.mxu1 %v1818_v56 }
 0x50c   :  { %1281 = vmatpush.bf16.msra.mxu3 %v1677_v62  ;;  %1268 = vmatpush.bf16.msrb.mxu2 %v1665_v4  ;;  %v1849_v62 = vld [vmem:[%s2504_s12] ss:$0 sm:$0xff] }
 0x50e   :  { %1432 = vmatpush.bf16.msrb.mxu0 %v1812_v49 }
 0x50f   :  { %1449 = vmatpush.bf16.msra.mxu1 %v1817_v17 }
 0x510   :  { %1282 = vmatpush.bf16.msra.mxu3 %v1669_v6  ;;  %1269 = vmatpush.bf16.msrb.mxu2 %v1657_v10 }
 0x512   :  { %1433 = vmatpush.bf16.msrb.mxu0 %v1811_v46 }
 0x514   :  { %1283 = vmatpush.bf16.msra.mxu3 %v1661_v12  ;;  %1270 = vmatpush.bf16.msrb.mxu2 %v1649_v16  ;;  %v1809_v16 = vld [vmem:[#allocation17 + $0x18] sm:$0xff] }
 0x518   :  { %1284 = vmatpush.bf16.msra.mxu3 %v1653_v19  ;;  %1271 = vmatpush.bf16.msrb.mxu2 %v1641_v29  ;;  %v1816_v19 = vld [vmem:[#allocation17 + $0x50] sm:$0xff]  ;;  %v1181_v29 = vperm.slane %v1179_v26, 0 }
 0x519   :  { %1450 = vmatpush.bf16.msra.mxu1 %v1816_v19 }
 0x51c   :  { %1285 = vmatpush.bf16.msra.mxu3 %v1645_v32  ;;  %1272 = vmatpush.bf16.msrb.mxu2 %v1633_v37 }
 0x520   :  { %1286 = vmatpush.bf16.msra.mxu3 %v1637_v38 }
 0x572   :  { %v1109_v18 = vpop.xlane.xlu1 %1108 }
 0x573   :  { %v2462_v20 = vmul.f32 %v1109_v18, %v2318_v25  ;;  %v1808_v18 = vld [vmem:[#allocation17 + $0x10] sm:$0xff] }
 0x574   :  { %v1117_v21 = vpop.xlane.xlu2 %1116 }
 0x575   :  { %v1122_v27 = vmul.f32 %v2462_v20, %v2462_v20  ;;  %v1120_v28 = vmul.f32 %v1117_v21, %v2318_v25  ;;  %v1126_v6 = vsub.f32 %v2450_v42, %v2462_v20  ;;  %v1807_v20 = vld [vmem:[#allocation17 + $0x8] sm:$0xff] }
 0x576   :  { %v1815_v21 = vld [vmem:[#allocation17 + $0x48] sm:$0xff] }
 0x577   :  { %v1124_v36 = vsub.f32 %v1120_v28, %v1122_v27  ;;  %1451 = vmatpush.bf16.msra.mxu1 %v1815_v21 }
 0x579   :  { %v1128_v39 = vadd.f32 1e-06, %v1124_v36 }
 0x57a   :  { %v1111_v40 = vpop.xlane.xlu0 %1110 }
 0x57b   :  { %1890 = vrsqrt.f32 %v1128_v39  ;;  %v1113_v41 = vmul.f32 %v1111_v40, %v2318_v25  ;;  %vm1136_vm14 = vweird.f32 %v1128_v39  ;;  %1452 = vmatpush.bf16.msra.mxu1 %v1814_v23 }
 0x57c   :  { %v1119_v43 = vpop.xlane.xlu1 %1118 }
 0x57d   :  { %v1123_v44 = vmul.f32 %v1113_v41, %v1113_v41  ;;  %v1121_v24 = vmul.f32 %v1119_v43, %v2318_v25  ;;  %v1810_v25 = vld [vmem:[#allocation17 + $0x20] sm:$0xff]  ;;  %v1127_v8 = vsub.f32 %v2456_v47, %v1113_v41 }
 0x57e   :  { %1434 = vmatpush.bf16.msrb.mxu0 %v1810_v25 }
 0x57f   :  { %v1125_v0 = vsub.f32 %v1121_v24, %v1123_v44  ;;  %v1851_v44 = vld [vmem:[%s2509_s17] ss:$0 sm:$0xff] }
 0x581   :  { %v1891_v51 = vpop.eup %1890  ;;  %v1129_v52 = vadd.f32 1e-06, %v1125_v0 }
 0x582   :  { %v1131_v53 = vmul.f32 %v1891_v51, %v1128_v39  ;;  %vm1137_vm13 = vweird.f32 %v1891_v51  ;;  %1435 = vmatpush.bf16.msrb.mxu0 %v1809_v16 }
 0x583   :  { %1892 = vrsqrt.f32 %v1129_v52  ;;  %vm1138_vm15 = vmor %vm1136_vm14, %vm1137_vm13  ;;  %vm1146_vm1 = vweird.f32 %v1129_v52 }
 0x584   :  { %v1132_v55 = vmul.f32 %v1891_v51, %v1131_v53 }
 0x586   :  { %v1133_v2 = vmul.f32 0.5, %v1132_v55  ;;  %1436 = vmatpush.bf16.msrb.mxu0 %v1808_v18 }
 0x588   :  { %v1134_v57 = vsub.f32 1.5, %v1133_v2 }
 0x589   :  { %v1893_v58 = vpop.eup %1892 }
 0x58a   :  { %v1135_v59 = vmul.f32 %v1891_v51, %v1134_v57  ;;  %v1141_v60 = vmul.f32 %v1893_v58, %v1129_v52  ;;  %vm1147_vm0 = vweird.f32 %v1893_v58  ;;  %1437 = vmatpush.bf16.msrb.mxu0 %v1807_v20 }
 0x58b   :  { %vm1148_vm2 = vmor %vm1146_vm1, %vm1147_vm0 }
 0x58c   :  { %v1142_v61 = vmul.f32 %v1893_v58, %v1141_v60  ;;  %v1139_v63 = vsel %vm1138_vm15, %v1891_v51, %v1135_v59 }
 0x58d   :  { %v1153_v4 = vmul.f32 %v1849_v62, %v1139_v63 }
 0x58e   :  { %v1143_v1 = vmul.f32 0.5, %v1142_v61  ;;  %1438 = vmatpush.bf16.msrb.mxu0 %v1806_v22 }
 0x58f   :  { %v1155_v10 = vmul.f32 %v1153_v4, %v1126_v6 }
 0x590   :  { %v1144_v3 = vsub.f32 1.5, %v1143_v1 }
 0x591   :  { %v1160_v13 = vadd.f32 %v1850_v11, %v1155_v10 }
 0x592   :  { %v1145_v5 = vmul.f32 %v1893_v58, %v1144_v3 }
 0x594   :  { %v1149_v7 = vsel %vm1148_vm2, %v1893_v58, %v1145_v5 }
 0x595   :  { %v1154_v9 = vmul.f32 %v1849_v62, %v1149_v7 }
 0x597   :  { %v1156_v12 = vmul.f32 %v1154_v9, %v1127_v8 }
 0x599   :  { %v1161_v14 = vadd.f32 %v1850_v11, %v1156_v12 }
 0x59b   :  { %v1162_v15 = vpack.c.bf16 %v1161_v14, %v1160_v13 }
 0x59d   :  { %1273 = vmatmul.bf16.vlgmr.msrb.gmra.mxu2 %v1162_v15  ;;  %1287 = vmatmul.bf16.vlgmr.msra.gmra.mxu3 %v1162_v15 }
 0x620   :  { %v1274_v27 = vpop.f32.mrf.mxu2  ;;  %v1288_v28 = vpop.f32.mrf.mxu3 }
 0x621   :  { %v1275_v31 = vadd.f32 %v1274_v27, %v1181_v29  ;;  %v1289_v33 = vadd.f32 %v1288_v28, %v1182_v30 }
 0x623   :  { %v1293_v37 = vmax.f32 %v1275_v31, 0.0  ;;  %v1294_v38 = vmax.f32 %v1289_v33, 0.0 }
 0x628   :  { %v1276_v32 = vpop.f32.mrf.mxu2  ;;  %v1290_v34 = vpop.f32.mrf.mxu3 }
 0x629   :  { %v1277_v35 = vadd.f32 %v1276_v32, %v1181_v29  ;;  %v1291_v36 = vadd.f32 %v1290_v34, %v1182_v30 }
 0x62b   :  { %v1295_v39 = vmax.f32 %v1277_v35, 0.0  ;;  %v1296_v40 = vmax.f32 %v1291_v36, 0.0 }
 0x62d   :  { %v1297_v41 = vpack.c.bf16 %v1295_v39, %v1293_v37  ;;  %v1298_v43 = vpack.c.bf16 %v1296_v40, %v1294_v38 }
 0x62f   :  { %1439 = vmatmul.bf16.vlgmr.msrb.gmra.mxu0 %v1297_v41  ;;  %1453 = vmatmul.bf16.vlgmr.msra.gmra.mxu1 %v1298_v43 }
 0x6ac   :  { %v1440_v24 = vpop.f32.mrf.mxu0  ;;  %v1454_v45 = vpop.f32.mrf.mxu1 }
 0x6ad   :  { %v1441_v48 = vadd.f32 %v1851_v44, %v1440_v24 }
 0x6af   :  { %v1455_v0 = vadd.f32 %v1454_v45, %v1441_v48 }
 0x6b1   :  { %v1459_v49 = vadd.f32 %v1455_v0, %v2450_v42 }
 0x6b3   :  { %1461 = vst [vmem:[#allocation18] sm:$0xff] %v1459_v49 }
 0x6b4   :  { %v1442_v50 = vpop.f32.mrf.mxu0  ;;  %v1456_v52 = vpop.f32.mrf.mxu1 }
 0x6b5   :  { %v1443_v51 = vadd.f32 %v1851_v44, %v1442_v50 }
 0x6b7   :  { %v1457_v53 = vadd.f32 %v1456_v52, %v1443_v51 }
 0x6b9   :  { %v1460_v46 = vadd.f32 %v1457_v53, %v2456_v47 }
 0x6bb   :  { %1462 = vst [vmem:[#allocation18 + $0x8] sm:$0xff] %v1460_v46 }
 0x6bc   :  { %1475 = dma.vmem_to_hbm [thread:$0]  %s1468_s14, 256, %s1470_s10, [#allocation5], %s2154_s8, %s2154_s8, %s2155_s27  }
 0x6bd   :  { %2144 = dma.done.wait [#allocation5], 256  }
 0x6be   :  { %2145 = vsyncadd [#allocation5], 4294967040 }
 0x6bf   :  { %1480 = vsyncpa [#allocation4], 1 }
 0x6c0   :  { %1481 = vsyncpa [#allocation7], 1 }
 0x6c1   :  { %1482 = vsyncpa [#allocation10], 1 }
 0x6c2   :  { %1483 = vsyncpa [#allocation13], 1 }
 0x6c3   :  { %1484 = vsyncpa [#allocation16], 1 }
 0x6c4   :  { %1485 = vsyncpa [#allocation5], 1 }

</bundles_post_ra>
